<compile_context>
chip_gen: v7x
topology: tpu7x:2x2x1
jax: 0.10.0
libtpu: 0.0.40
codegen_flags: <defaults>
</compile_context>

<pallas_src>
import functools
import math

import jax
import jax.numpy as jnp
import numpy as np
from jax.experimental import pallas as pl
from jax.experimental.pallas import tpu as pltpu


# ----------------------------------------------------------------------------
# Fused kernel: the whole AlbertLayerGroup for ONE batch element (grid axis).
# ----------------------------------------------------------------------------
def albert_group_kernel(
    x_ref, mask_ref,
    wqkv_ref, bqkv_ref, wd_ref, bd_ref, ln1g_ref, ln1b_ref,
    wffn_ref, bffn_ref, wffo_ref, bffo_ref, ln2g_ref, ln2b_ref,
    out_ref,
    *, num_layers, num_heads, head_dim, hidden, eps,
):
    f32 = jnp.float32
    bf16 = jnp.bfloat16

    x = x_ref[...].astype(f32)          # (S, H) rows of this batch element
    mask = mask_ref[...].astype(f32)    # (1, S) additive key mask

    def layer_norm(v, g, b):
        mu = jnp.mean(v, axis=-1, keepdims=True)
        var = jnp.mean(jnp.square(v - mu), axis=-1, keepdims=True)
        return (v - mu) * jax.lax.rsqrt(var + eps) * g + b

    for l in range(num_layers):         # unrolled: inner_group_num is small
        # --- fused QKV: one wide matmul, bf16 operands, f32 accumulation.
        #     1/sqrt(dh) is pre-folded into w_q / b_q in the wrapper.
        qkv = jnp.dot(x.astype(bf16), wqkv_ref[l],
                      preferred_element_type=f32) + bqkv_ref[l]       # (S, 3H)
        q = qkv[:, :hidden]
        k = qkv[:, hidden:2 * hidden]
        v = qkv[:, 2 * hidden:]

        # --- split heads: static lane slices stacked to (NH, S, dh)
        qh = jnp.stack([q[:, h * head_dim:(h + 1) * head_dim]
                        for h in range(num_heads)], axis=0)
        kh = jnp.stack([k[:, h * head_dim:(h + 1) * head_dim]
                        for h in range(num_heads)], axis=0)
        vh = jnp.stack([v[:, h * head_dim:(h + 1) * head_dim]
                        for h in range(num_heads)], axis=0)

        # --- attention, batched over all heads of this batch element
        scores = jnp.einsum('hqd,hkd->hqk', qh.astype(bf16), kh.astype(bf16),
                            preferred_element_type=f32)               # (NH,S,S)
        scores = scores + mask                                        # bcast (1,S)
        m = jnp.max(scores, axis=-1, keepdims=True)
        p = jnp.exp(scores - m)
        s = jnp.sum(p, axis=-1, keepdims=True)
        probs = p * pl.reciprocal(s, approx=True)
        # TODO(synk): attention_dropout / output_dropout are identity (eval
        #             mode); head_mask entries are None, so no probs*head_mask.
        ctx = jnp.einsum('hqk,hkd->hqd', probs.astype(bf16), vh.astype(bf16),
                         preferred_element_type=f32)                  # (NH,S,dh)

        # --- merge heads (lane concat) + single K=H output projection
        ctx2d = jnp.concatenate([ctx[h] for h in range(num_heads)], axis=-1)
        proj = jnp.dot(ctx2d.astype(bf16), wd_ref[l],
                       preferred_element_type=f32) + bd_ref[l]
        attn_out = layer_norm(x + proj, ln1g_ref[l], ln1b_ref[l])

        # --- FFN ('gelu_new' tanh approx) + residual + LayerNorm
        hmid = jnp.dot(attn_out.astype(bf16), wffn_ref[l],
                       preferred_element_type=f32) + bffn_ref[l]
        hmid = jax.nn.gelu(hmid, approximate=True)
        ffn = jnp.dot(hmid.astype(bf16), wffo_ref[l],
                      preferred_element_type=f32) + bffo_ref[l]
        x = layer_norm(ffn + attn_out, ln2g_ref[l], ln2b_ref[l])

    out_ref[...] = x.astype(out_ref.dtype)


# ----------------------------------------------------------------------------
# Wrapper: stack per-layer params, fuse QKV weights, single grid-over-batch call.
# ----------------------------------------------------------------------------
def albert_layer_group_pallas(x, attn_mask, layer_params, *, num_heads, eps):
    B, S, H = x.shape
    L = len(layer_params)
    dh = H // num_heads
    I = layer_params[0]['w_ffn'].shape[-1]
    bf16 = jnp.bfloat16

    def stk(key):
        return jnp.stack([p[key] for p in layer_params], axis=0)

    scale = 1.0 / math.sqrt(dh)
    # Fused QKV weights (L, H, 3H); score scale folded into the q slice.
    wqkv = jnp.concatenate([stk('w_q') * scale, stk('w_k'), stk('w_v')],
                           axis=-1).astype(bf16)
    bqkv = jnp.concatenate([stk('b_q') * scale, stk('b_k'), stk('b_v')],
                           axis=-1)                         # (L, 1, 3H) f32
    wd = stk('w_dense').astype(bf16)                        # (L, H, H)
    bd = stk('b_dense')                                     # (L, 1, H)
    ln1g, ln1b = stk('ln1_g'), stk('ln1_b')
    wffn = stk('w_ffn').astype(bf16)                        # (L, H, I)
    bffn = stk('b_ffn')
    wffo = stk('w_ffn_out').astype(bf16)                    # (L, I, H)
    bffo = stk('b_ffn_out')
    ln2g, ln2b = stk('ln2_g'), stk('ln2_b')

    weights = (wqkv, bqkv, wd, bd, ln1g, ln1b,
               wffn, bffn, wffo, bffo, ln2g, ln2b)

    kernel = functools.partial(
        albert_group_kernel, num_layers=L, num_heads=num_heads,
        head_dim=dh, hidden=H, eps=eps)

    # Per-batch activation / mask blocks; weights resident (constant block idx
    # across the grid -> fetched into VMEM once).
    x_spec = pl.BlockSpec((None, S, H), lambda b: (b, 0, 0))
    m_spec = pl.BlockSpec((None, 1, S), lambda b: (b, 0, 0))
    w_specs = [pl.BlockSpec(w.shape, lambda b: (0, 0, 0)) for w in weights]

    flops_per_layer = (2 * B * S * H * 3 * H              # fused QKV
                       + 4 * B * num_heads * S * S * dh   # scores + context
                       + 2 * B * S * H * H                # output projection
                       + 4 * B * S * H * I)               # FFN in + out
    cost = pl.CostEstimate(
        flops=L * flops_per_layer,
        transcendentals=L * (B * num_heads * S * S + B * S * I),
        bytes_accessed=2 * x.nbytes + attn_mask.nbytes
                       + sum(int(w.nbytes) for w in weights))

    out = pl.pallas_call(
        kernel,
        out_shape=jax.ShapeDtypeStruct((B, S, H), x.dtype),
        grid=(B,),
        in_specs=[x_spec, m_spec] + w_specs,
        out_specs=pl.BlockSpec((None, S, H), lambda b: (b, 0, 0)),
        compiler_params=pltpu.CompilerParams(
            dimension_semantics=("parallel",),    # megacore split on v7x
            vmem_limit_bytes=64 * 1024 * 1024),
        cost_estimate=cost,
    )(x, attn_mask, *weights)
    return out


# ----------------------------------------------------------------------------
# Pure-JAX reference (mirrors the PyTorch forward, eval mode, f32)
# ----------------------------------------------------------------------------
def _layernorm(x, g, b, eps):
    mean = jnp.mean(x, axis=-1, keepdims=True)
    var = jnp.mean(jnp.square(x - mean), axis=-1, keepdims=True)
    return (x - mean) * jax.lax.rsqrt(var + eps) * g + b


def albert_layer_ref(x, attn_mask, p, *, num_heads, eps):
    B, S, H = x.shape
    dh = H // num_heads
    q = x @ p['w_q'] + p['b_q']
    k = x @ p['w_k'] + p['b_k']
    v = x @ p['w_v'] + p['b_v']
    qh = q.reshape(B, S, num_heads, dh).transpose(0, 2, 1, 3)
    kh = k.reshape(B, S, num_heads, dh).transpose(0, 2, 1, 3)
    vh = v.reshape(B, S, num_heads, dh).transpose(0, 2, 1, 3)
    scores = jnp.einsum('bhqd,bhkd->bhqk', qh, kh) / math.sqrt(dh)
    scores = scores + attn_mask[:, None, :, :]            # (B,1,1,S) broadcast
    probs = jax.nn.softmax(scores, axis=-1)
    ctx = jnp.einsum('bhqk,bhkd->bhqd', probs, vh)
    ctx = ctx.transpose(0, 2, 1, 3).reshape(B, S, H)
    proj = ctx @ p['w_dense'] + p['b_dense']
    attn_out = _layernorm(x + proj, p['ln1_g'], p['ln1_b'], eps)
    h = jax.nn.gelu(attn_out @ p['w_ffn'] + p['b_ffn'], approximate=True)
    ffn_out = h @ p['w_ffn_out'] + p['b_ffn_out']
    return _layernorm(ffn_out + attn_out, p['ln2_g'], p['ln2_b'], eps)


# ----------------------------------------------------------------------------
# Deterministic parameter construction (torch Linear weights are (out,in);
# we keep them pre-transposed to (in,out)).
# ----------------------------------------------------------------------------
def make_layer_params(key, H, I):
    ks = jax.random.split(key, 16)
    n = lambda k, shape: (jax.random.normal(k, shape, jnp.float32) * 0.02)
    return {
        'w_q': n(ks[0], (H, H)), 'b_q': n(ks[1], (1, H)),
        'w_k': n(ks[2], (H, H)), 'b_k': n(ks[3], (1, H)),
        'w_v': n(ks[4], (H, H)), 'b_v': n(ks[5], (1, H)),
        'w_dense': n(ks[6], (H, H)), 'b_dense': n(ks[7], (1, H)),
        'ln1_g': jnp.ones((1, H), jnp.float32) + n(ks[8], (1, H)),
        'ln1_b': n(ks[9], (1, H)),
        'w_ffn': n(ks[10], (H, I)), 'b_ffn': n(ks[11], (1, I)),
        'w_ffn_out': n(ks[12], (I, H)), 'b_ffn_out': n(ks[13], (1, H)),
        'ln2_g': jnp.ones((1, H), jnp.float32) + n(ks[14], (1, H)),
        'ln2_b': n(ks[15], (1, H)),
    }


if __name__ == "__main__":
    # Small Albert-ish config
    B, S, H, NH, I = 2, 8, 32, 4, 64
    INNER_GROUP_NUM = 2
    EPS = 1e-12

    root = jax.random.PRNGKey(0)
    k_x, k_mask, *k_layers = jax.random.split(root, 2 + INNER_GROUP_NUM)

    x = jax.random.normal(k_x, (B, S, H), jnp.float32)
    # Additive attention mask (transformers convention): 0 keep, -1e9 masked.
    keep = (jax.random.uniform(k_mask, (B, S)) > 0.1).astype(jnp.float32)
    attn_mask = ((1.0 - keep) * -1e9).reshape(B, 1, S)     # (B,1,S) additive

    layer_params = [make_layer_params(k, H, I) for k in k_layers]

    out = albert_layer_group_pallas(x, attn_mask, layer_params,
                                    num_heads=NH, eps=EPS)
    out = jax.block_until_ready(out)

    # Pure-JAX f32 reference. Tolerance accounts for bf16 matmul operands and
    # the EUP approximate reciprocal in the softmax (inference-grade).
    ref = x
    for p in layer_params:
        ref = albert_layer_ref(ref, attn_mask, p, num_heads=NH, eps=EPS)
    np.testing.assert_allclose(np.asarray(out), np.asarray(ref),
                               atol=5e-2, rtol=5e-2)

    print("KERNEL_OK")
</pallas_src>

<mosaic_0001>
module attributes {stable_mosaic.version = 11 : i64} {
  func.func @albert_group_kernel(%arg0: i32, %arg1: memref<1x8x32xf32, #tpu.memory_space<vmem>>, %arg2: memref<1x1x8xf32, #tpu.memory_space<vmem>>, %arg3: memref<2x32x96xbf16, #tpu.memory_space<vmem>>, %arg4: memref<2x1x96xf32, #tpu.memory_space<vmem>>, %arg5: memref<2x32x32xbf16, #tpu.memory_space<vmem>>, %arg6: memref<2x1x32xf32, #tpu.memory_space<vmem>>, %arg7: memref<2x1x32xf32, #tpu.memory_space<vmem>>, %arg8: memref<2x1x32xf32, #tpu.memory_space<vmem>>, %arg9: memref<2x32x64xbf16, #tpu.memory_space<vmem>>, %arg10: memref<2x1x64xf32, #tpu.memory_space<vmem>>, %arg11: memref<2x64x32xbf16, #tpu.memory_space<vmem>>, %arg12: memref<2x1x32xf32, #tpu.memory_space<vmem>>, %arg13: memref<2x1x32xf32, #tpu.memory_space<vmem>>, %arg14: memref<2x1x32xf32, #tpu.memory_space<vmem>>, %arg15: memref<1x8x32xf32, #tpu.memory_space<vmem>>) attributes {dimension_semantics = [#tpu.dimension_semantics<parallel>], iteration_bounds = array<i64: 2>, scalar_prefetch = 0 : i64, scratch_operands = 0 : i64, tpu.core_type = #tpu.core_type<tc>, window_params = [{transform_indices = @transform_0, window_bounds = array<i64: 1, 8, 32>}, {transform_indices = @transform_1, window_bounds = array<i64: 1, 1, 8>}, {pipeline_mode = #tpu.pipeline_mode<synchronous>, transform_indices = @transform_2, window_bounds = array<i64: 2, 32, 96>}, {pipeline_mode = #tpu.pipeline_mode<synchronous>, transform_indices = @transform_3, window_bounds = array<i64: 2, 1, 96>}, {pipeline_mode = #tpu.pipeline_mode<synchronous>, transform_indices = @transform_4, window_bounds = array<i64: 2, 32, 32>}, {pipeline_mode = #tpu.pipeline_mode<synchronous>, transform_indices = @transform_5, window_bounds = array<i64: 2, 1, 32>}, {pipeline_mode = #tpu.pipeline_mode<synchronous>, transform_indices = @transform_6, window_bounds = array<i64: 2, 1, 32>}, {pipeline_mode = #tpu.pipeline_mode<synchronous>, transform_indices = @transform_7, window_bounds = array<i64: 2, 1, 32>}, {pipeline_mode = #tpu.pipeline_mode<synchronous>, transform_indices = @transform_8, window_bounds = array<i64: 2, 32, 64>}, {pipeline_mode = #tpu.pipeline_mode<synchronous>, transform_indices = @transform_9, window_bounds = array<i64: 2, 1, 64>}, {pipeline_mode = #tpu.pipeline_mode<synchronous>, transform_indices = @transform_10, window_bounds = array<i64: 2, 64, 32>}, {pipeline_mode = #tpu.pipeline_mode<synchronous>, transform_indices = @transform_11, window_bounds = array<i64: 2, 1, 32>}, {pipeline_mode = #tpu.pipeline_mode<synchronous>, transform_indices = @transform_12, window_bounds = array<i64: 2, 1, 32>}, {pipeline_mode = #tpu.pipeline_mode<synchronous>, transform_indices = @transform_13, window_bounds = array<i64: 2, 1, 32>}, {transform_indices = @transform_14, window_bounds = array<i64: 1, 8, 32>}]} {
    %c0 = arith.constant 0 : index
    %c0_0 = arith.constant 0 : index
    %c0_1 = arith.constant 0 : index
    %0 = vector.load %arg1[%c0, %c0_0, %c0_1] : memref<1x8x32xf32, #tpu.memory_space<vmem>>, vector<1x8x32xf32>
    %1 = vector.shape_cast %0 : vector<1x8x32xf32> to vector<8x32xf32>
    %c0_2 = arith.constant 0 : index
    %c0_3 = arith.constant 0 : index
    %c0_4 = arith.constant 0 : index
    %2 = vector.load %arg2[%c0_2, %c0_3, %c0_4] : memref<1x1x8xf32, #tpu.memory_space<vmem>>, vector<1x1x8xf32>
    %3 = vector.shape_cast %2 : vector<1x1x8xf32> to vector<1x8xf32>
    %4 = arith.truncf %1 : vector<8x32xf32> to vector<8x32xbf16>
    %c0_5 = arith.constant 0 : index
    %c0_6 = arith.constant 0 : index
    %c0_7 = arith.constant 0 : index
    %5 = vector.load %arg3[%c0_5, %c0_6, %c0_7] : memref<2x32x96xbf16, #tpu.memory_space<vmem>>, vector<1x32x96xbf16>
    %6 = vector.shape_cast %5 : vector<1x32x96xbf16> to vector<32x96xbf16>
    %cst = arith.constant dense<0.000000e+00> : vector<8x96xf32>
    %7 = tpu.matmul %4, %6, %cst {dimension_numbers = #tpu.dot_dimension_numbers<[1], [0], [0], [1], [0, 0, 1, 1], [], []>} : vector<8x32xbf16>, vector<32x96xbf16>, vector<8x96xf32> -> vector<8x96xf32>
    %c0_8 = arith.constant 0 : index
    %c0_9 = arith.constant 0 : index
    %c0_10 = arith.constant 0 : index
    %8 = vector.load %arg4[%c0_8, %c0_9, %c0_10] : memref<2x1x96xf32, #tpu.memory_space<vmem>>, vector<1x1x96xf32>
    %9 = vector.shape_cast %8 : vector<1x1x96xf32> to vector<1x96xf32>
    %10 = vector.broadcast %9 : vector<1x96xf32> to vector<8x96xf32>
    %11 = arith.addf %7, %10 : vector<8x96xf32>
    %12 = vector.extract_strided_slice %11 {offsets = [0, 0], sizes = [8, 32], strides = [1, 1]} : vector<8x96xf32> to vector<8x32xf32>
    %13 = vector.extract_strided_slice %11 {offsets = [0, 32], sizes = [8, 32], strides = [1, 1]} : vector<8x96xf32> to vector<8x32xf32>
    %14 = vector.extract_strided_slice %11 {offsets = [0, 64], sizes = [8, 32], strides = [1, 1]} : vector<8x96xf32> to vector<8x32xf32>
    %15 = vector.extract_strided_slice %12 {offsets = [0, 0], sizes = [8, 8], strides = [1, 1]} : vector<8x32xf32> to vector<8x8xf32>
    %16 = vector.extract_strided_slice %12 {offsets = [0, 8], sizes = [8, 8], strides = [1, 1]} : vector<8x32xf32> to vector<8x8xf32>
    %17 = vector.extract_strided_slice %12 {offsets = [0, 16], sizes = [8, 8], strides = [1, 1]} : vector<8x32xf32> to vector<8x8xf32>
    %18 = vector.extract_strided_slice %12 {offsets = [0, 24], sizes = [8, 8], strides = [1, 1]} : vector<8x32xf32> to vector<8x8xf32>
    %19 = vector.shape_cast %15 : vector<8x8xf32> to vector<1x8x8xf32>
    %20 = vector.shape_cast %16 : vector<8x8xf32> to vector<1x8x8xf32>
    %21 = vector.shape_cast %17 : vector<8x8xf32> to vector<1x8x8xf32>
    %22 = vector.shape_cast %18 : vector<8x8xf32> to vector<1x8x8xf32>
    %23 = tpu.concatenate %19, %20, %21, %22 in 0 : vector<1x8x8xf32>, vector<1x8x8xf32>, vector<1x8x8xf32>, vector<1x8x8xf32> -> vector<4x8x8xf32>
    %24 = vector.extract_strided_slice %13 {offsets = [0, 0], sizes = [8, 8], strides = [1, 1]} : vector<8x32xf32> to vector<8x8xf32>
    %25 = vector.extract_strided_slice %13 {offsets = [0, 8], sizes = [8, 8], strides = [1, 1]} : vector<8x32xf32> to vector<8x8xf32>
    %26 = vector.extract_strided_slice %13 {offsets = [0, 16], sizes = [8, 8], strides = [1, 1]} : vector<8x32xf32> to vector<8x8xf32>
    %27 = vector.extract_strided_slice %13 {offsets = [0, 24], sizes = [8, 8], strides = [1, 1]} : vector<8x32xf32> to vector<8x8xf32>
    %28 = vector.shape_cast %24 : vector<8x8xf32> to vector<1x8x8xf32>
    %29 = vector.shape_cast %25 : vector<8x8xf32> to vector<1x8x8xf32>
    %30 = vector.shape_cast %26 : vector<8x8xf32> to vector<1x8x8xf32>
    %31 = vector.shape_cast %27 : vector<8x8xf32> to vector<1x8x8xf32>
    %32 = tpu.concatenate %28, %29, %30, %31 in 0 : vector<1x8x8xf32>, vector<1x8x8xf32>, vector<1x8x8xf32>, vector<1x8x8xf32> -> vector<4x8x8xf32>
    %33 = vector.extract_strided_slice %14 {offsets = [0, 0], sizes = [8, 8], strides = [1, 1]} : vector<8x32xf32> to vector<8x8xf32>
    %34 = vector.extract_strided_slice %14 {offsets = [0, 8], sizes = [8, 8], strides = [1, 1]} : vector<8x32xf32> to vector<8x8xf32>
    %35 = vector.extract_strided_slice %14 {offsets = [0, 16], sizes = [8, 8], strides = [1, 1]} : vector<8x32xf32> to vector<8x8xf32>
    %36 = vector.extract_strided_slice %14 {offsets = [0, 24], sizes = [8, 8], strides = [1, 1]} : vector<8x32xf32> to vector<8x8xf32>
    %37 = vector.shape_cast %33 : vector<8x8xf32> to vector<1x8x8xf32>
    %38 = vector.shape_cast %34 : vector<8x8xf32> to vector<1x8x8xf32>
    %39 = vector.shape_cast %35 : vector<8x8xf32> to vector<1x8x8xf32>
    %40 = vector.shape_cast %36 : vector<8x8xf32> to vector<1x8x8xf32>
    %41 = tpu.concatenate %37, %38, %39, %40 in 0 : vector<1x8x8xf32>, vector<1x8x8xf32>, vector<1x8x8xf32>, vector<1x8x8xf32> -> vector<4x8x8xf32>
    %42 = arith.truncf %23 : vector<4x8x8xf32> to vector<4x8x8xbf16>
    %43 = arith.truncf %32 : vector<4x8x8xf32> to vector<4x8x8xbf16>
    "tpu.trace_start"() <{level = 10 : i32, message = "hqd,hkd->hqk"}> : () -> ()
    %cst_11 = arith.constant dense<0.000000e+00> : vector<4x8x8xf32>
    %44 = tpu.matmul %42, %43, %cst_11 {dimension_numbers = #tpu.dot_dimension_numbers<[2], [2], [1], [1], [0, 0, 0, 1, 1, 1], [0], [0]>} : vector<4x8x8xbf16>, vector<4x8x8xbf16>, vector<4x8x8xf32> -> vector<4x8x8xf32>
    "tpu.trace_stop"() : () -> ()
    %45 = vector.shape_cast %3 : vector<1x8xf32> to vector<1x1x8xf32>
    %46 = vector.broadcast %45 : vector<1x1x8xf32> to vector<4x8x8xf32>
    %47 = arith.addf %44, %46 : vector<4x8x8xf32>
    %cst_12 = arith.constant dense<0xFF800000> : vector<4x8xf32>
    %48 = vector.multi_reduction <maximumf>, %47, %cst_12 [2] : vector<4x8x8xf32> to vector<4x8xf32>
    %49 = vector.shape_cast %48 : vector<4x8xf32> to vector<4x8x1xf32>
    %50 = vector.broadcast %49 : vector<4x8x1xf32> to vector<4x8x8xf32>
    %51 = arith.subf %47, %50 : vector<4x8x8xf32>
    %52 = math.exp %51 : vector<4x8x8xf32>
    %cst_13 = arith.constant dense<0.000000e+00> : vector<4x8xf32>
    %53 = vector.multi_reduction <add>, %52, %cst_13 [2] : vector<4x8x8xf32> to vector<4x8xf32>
    %54 = vector.shape_cast %53 : vector<4x8xf32> to vector<4x8x1xf32>
    %55 = tpu.reciprocal %54 {approx = true} : vector<4x8x1xf32> -> vector<4x8x1xf32>
    %56 = vector.broadcast %55 : vector<4x8x1xf32> to vector<4x8x8xf32>
    %57 = arith.mulf %52, %56 : vector<4x8x8xf32>
    %58 = arith.truncf %57 : vector<4x8x8xf32> to vector<4x8x8xbf16>
    %59 = arith.truncf %41 : vector<4x8x8xf32> to vector<4x8x8xbf16>
    "tpu.trace_start"() <{level = 10 : i32, message = "hqk,hkd->hqd"}> : () -> ()
    %cst_14 = arith.constant dense<0.000000e+00> : vector<4x8x8xf32>
    %60 = tpu.matmul %58, %59, %cst_14 {dimension_numbers = #tpu.dot_dimension_numbers<[2], [1], [1], [2], [0, 0, 0, 1, 1, 2], [0], [0]>} : vector<4x8x8xbf16>, vector<4x8x8xbf16>, vector<4x8x8xf32> -> vector<4x8x8xf32>
    "tpu.trace_stop"() : () -> ()
    %61 = vector.extract_strided_slice %60 {offsets = [0, 0, 0], sizes = [1, 8, 8], strides = [1, 1, 1]} : vector<4x8x8xf32> to vector<1x8x8xf32>
    %62 = vector.shape_cast %61 : vector<1x8x8xf32> to vector<8x8xf32>
    %63 = vector.extract_strided_slice %60 {offsets = [1, 0, 0], sizes = [1, 8, 8], strides = [1, 1, 1]} : vector<4x8x8xf32> to vector<1x8x8xf32>
    %64 = vector.shape_cast %63 : vector<1x8x8xf32> to vector<8x8xf32>
    %65 = vector.extract_strided_slice %60 {offsets = [2, 0, 0], sizes = [1, 8, 8], strides = [1, 1, 1]} : vector<4x8x8xf32> to vector<1x8x8xf32>
    %66 = vector.shape_cast %65 : vector<1x8x8xf32> to vector<8x8xf32>
    %67 = vector.extract_strided_slice %60 {offsets = [3, 0, 0], sizes = [1, 8, 8], strides = [1, 1, 1]} : vector<4x8x8xf32> to vector<1x8x8xf32>
    %68 = vector.shape_cast %67 : vector<1x8x8xf32> to vector<8x8xf32>
    %69 = tpu.concatenate %62, %64, %66, %68 in 1 : vector<8x8xf32>, vector<8x8xf32>, vector<8x8xf32>, vector<8x8xf32> -> vector<8x32xf32>
    %70 = arith.truncf %69 : vector<8x32xf32> to vector<8x32xbf16>
    %c0_15 = arith.constant 0 : index
    %c0_16 = arith.constant 0 : index
    %c0_17 = arith.constant 0 : index
    %71 = vector.load %arg5[%c0_15, %c0_16, %c0_17] : memref<2x32x32xbf16, #tpu.memory_space<vmem>>, vector<1x32x32xbf16>
    %72 = vector.shape_cast %71 : vector<1x32x32xbf16> to vector<32x32xbf16>
    %cst_18 = arith.constant dense<0.000000e+00> : vector<8x32xf32>
    %73 = tpu.matmul %70, %72, %cst_18 {dimension_numbers = #tpu.dot_dimension_numbers<[1], [0], [0], [1], [0, 0, 1, 1], [], []>} : vector<8x32xbf16>, vector<32x32xbf16>, vector<8x32xf32> -> vector<8x32xf32>
    %c0_19 = arith.constant 0 : index
    %c0_20 = arith.constant 0 : index
    %c0_21 = arith.constant 0 : index
    %74 = vector.load %arg6[%c0_19, %c0_20, %c0_21] : memref<2x1x32xf32, #tpu.memory_space<vmem>>, vector<1x1x32xf32>
    %75 = vector.shape_cast %74 : vector<1x1x32xf32> to vector<1x32xf32>
    %76 = vector.broadcast %75 : vector<1x32xf32> to vector<8x32xf32>
    %77 = arith.addf %73, %76 : vector<8x32xf32>
    %78 = arith.addf %1, %77 : vector<8x32xf32>
    %c0_22 = arith.constant 0 : index
    %c0_23 = arith.constant 0 : index
    %c0_24 = arith.constant 0 : index
    %79 = vector.load %arg7[%c0_22, %c0_23, %c0_24] : memref<2x1x32xf32, #tpu.memory_space<vmem>>, vector<1x1x32xf32>
    %80 = vector.shape_cast %79 : vector<1x1x32xf32> to vector<1x32xf32>
    %c0_25 = arith.constant 0 : index
    %c0_26 = arith.constant 0 : index
    %c0_27 = arith.constant 0 : index
    %81 = vector.load %arg8[%c0_25, %c0_26, %c0_27] : memref<2x1x32xf32, #tpu.memory_space<vmem>>, vector<1x1x32xf32>
    %82 = vector.shape_cast %81 : vector<1x1x32xf32> to vector<1x32xf32>
    %cst_28 = arith.constant dense<0.000000e+00> : vector<8xf32>
    %83 = vector.multi_reduction <add>, %78, %cst_28 [1] : vector<8x32xf32> to vector<8xf32>
    %84 = vector.shape_cast %83 : vector<8xf32> to vector<8x1xf32>
    %cst_29 = arith.constant 3.200000e+01 : f32
    %85 = vector.broadcast %cst_29 : f32 to vector<8x1xf32>
    %86 = arith.divf %84, %85 : vector<8x1xf32>
    %87 = vector.broadcast %86 : vector<8x1xf32> to vector<8x32xf32>
    %88 = arith.subf %78, %87 : vector<8x32xf32>
    %89 = arith.mulf %88, %88 : vector<8x32xf32>
    %cst_30 = arith.constant dense<0.000000e+00> : vector<8xf32>
    %90 = vector.multi_reduction <add>, %89, %cst_30 [1] : vector<8x32xf32> to vector<8xf32>
    %91 = vector.shape_cast %90 : vector<8xf32> to vector<8x1xf32>
    %cst_31 = arith.constant 3.200000e+01 : f32
    %92 = vector.broadcast %cst_31 : f32 to vector<8x1xf32>
    %93 = arith.divf %91, %92 : vector<8x1xf32>
    %94 = vector.broadcast %86 : vector<8x1xf32> to vector<8x32xf32>
    %95 = arith.subf %78, %94 : vector<8x32xf32>
    %cst_32 = arith.constant 9.99999996E-13 : f32
    %96 = vector.broadcast %cst_32 : f32 to vector<8x1xf32>
    %97 = arith.addf %93, %96 : vector<8x1xf32>
    %98 = math.rsqrt %97 : vector<8x1xf32>
    %99 = vector.broadcast %98 : vector<8x1xf32> to vector<8x32xf32>
    %100 = arith.mulf %95, %99 : vector<8x32xf32>
    %101 = vector.broadcast %80 : vector<1x32xf32> to vector<8x32xf32>
    %102 = arith.mulf %100, %101 : vector<8x32xf32>
    %103 = vector.broadcast %82 : vector<1x32xf32> to vector<8x32xf32>
    %104 = arith.addf %102, %103 : vector<8x32xf32>
    %105 = arith.truncf %104 : vector<8x32xf32> to vector<8x32xbf16>
    %c0_33 = arith.constant 0 : index
    %c0_34 = arith.constant 0 : index
    %c0_35 = arith.constant 0 : index
    %106 = vector.load %arg9[%c0_33, %c0_34, %c0_35] : memref<2x32x64xbf16, #tpu.memory_space<vmem>>, vector<1x32x64xbf16>
    %107 = vector.shape_cast %106 : vector<1x32x64xbf16> to vector<32x64xbf16>
    %cst_36 = arith.constant dense<0.000000e+00> : vector<8x64xf32>
    %108 = tpu.matmul %105, %107, %cst_36 {dimension_numbers = #tpu.dot_dimension_numbers<[1], [0], [0], [1], [0, 0, 1, 1], [], []>} : vector<8x32xbf16>, vector<32x64xbf16>, vector<8x64xf32> -> vector<8x64xf32>
    %c0_37 = arith.constant 0 : index
    %c0_38 = arith.constant 0 : index
    %c0_39 = arith.constant 0 : index
    %109 = vector.load %arg10[%c0_37, %c0_38, %c0_39] : memref<2x1x64xf32, #tpu.memory_space<vmem>>, vector<1x1x64xf32>
    %110 = vector.shape_cast %109 : vector<1x1x64xf32> to vector<1x64xf32>
    %111 = vector.broadcast %110 : vector<1x64xf32> to vector<8x64xf32>
    %112 = arith.addf %108, %111 : vector<8x64xf32>
    %113 = arith.mulf %112, %112 : vector<8x64xf32>
    %114 = arith.mulf %112, %113 : vector<8x64xf32>
    %cst_40 = arith.constant 4.471500e-02 : f32
    %115 = vector.broadcast %cst_40 : f32 to vector<8x64xf32>
    %116 = arith.mulf %115, %114 : vector<8x64xf32>
    %117 = arith.addf %112, %116 : vector<8x64xf32>
    %cst_41 = arith.constant 0.797884583 : f32
    %118 = vector.broadcast %cst_41 : f32 to vector<8x64xf32>
    %119 = arith.mulf %118, %117 : vector<8x64xf32>
    %120 = math.tanh %119 : vector<8x64xf32>
    %cst_42 = arith.constant 1.000000e+00 : f32
    %121 = vector.broadcast %cst_42 : f32 to vector<8x64xf32>
    %122 = arith.addf %121, %120 : vector<8x64xf32>
    %cst_43 = arith.constant 5.000000e-01 : f32
    %123 = vector.broadcast %cst_43 : f32 to vector<8x64xf32>
    %124 = arith.mulf %123, %122 : vector<8x64xf32>
    %125 = arith.mulf %112, %124 : vector<8x64xf32>
    %126 = arith.truncf %125 : vector<8x64xf32> to vector<8x64xbf16>
    %c0_44 = arith.constant 0 : index
    %c0_45 = arith.constant 0 : index
    %c0_46 = arith.constant 0 : index
    %127 = vector.load %arg11[%c0_44, %c0_45, %c0_46] : memref<2x64x32xbf16, #tpu.memory_space<vmem>>, vector<1x64x32xbf16>
    %128 = vector.shape_cast %127 : vector<1x64x32xbf16> to vector<64x32xbf16>
    %cst_47 = arith.constant dense<0.000000e+00> : vector<8x32xf32>
    %129 = tpu.matmul %126, %128, %cst_47 {dimension_numbers = #tpu.dot_dimension_numbers<[1], [0], [0], [1], [0, 0, 1, 1], [], []>} : vector<8x64xbf16>, vector<64x32xbf16>, vector<8x32xf32> -> vector<8x32xf32>
    %c0_48 = arith.constant 0 : index
    %c0_49 = arith.constant 0 : index
    %c0_50 = arith.constant 0 : index
    %130 = vector.load %arg12[%c0_48, %c0_49, %c0_50] : memref<2x1x32xf32, #tpu.memory_space<vmem>>, vector<1x1x32xf32>
    %131 = vector.shape_cast %130 : vector<1x1x32xf32> to vector<1x32xf32>
    %132 = vector.broadcast %131 : vector<1x32xf32> to vector<8x32xf32>
    %133 = arith.addf %129, %132 : vector<8x32xf32>
    %134 = arith.addf %133, %104 : vector<8x32xf32>
    %c0_51 = arith.constant 0 : index
    %c0_52 = arith.constant 0 : index
    %c0_53 = arith.constant 0 : index
    %135 = vector.load %arg13[%c0_51, %c0_52, %c0_53] : memref<2x1x32xf32, #tpu.memory_space<vmem>>, vector<1x1x32xf32>
    %136 = vector.shape_cast %135 : vector<1x1x32xf32> to vector<1x32xf32>
    %c0_54 = arith.constant 0 : index
    %c0_55 = arith.constant 0 : index
    %c0_56 = arith.constant 0 : index
    %137 = vector.load %arg14[%c0_54, %c0_55, %c0_56] : memref<2x1x32xf32, #tpu.memory_space<vmem>>, vector<1x1x32xf32>
    %138 = vector.shape_cast %137 : vector<1x1x32xf32> to vector<1x32xf32>
    %cst_57 = arith.constant dense<0.000000e+00> : vector<8xf32>
    %139 = vector.multi_reduction <add>, %134, %cst_57 [1] : vector<8x32xf32> to vector<8xf32>
    %140 = vector.shape_cast %139 : vector<8xf32> to vector<8x1xf32>
    %cst_58 = arith.constant 3.200000e+01 : f32
    %141 = vector.broadcast %cst_58 : f32 to vector<8x1xf32>
    %142 = arith.divf %140, %141 : vector<8x1xf32>
    %143 = vector.broadcast %142 : vector<8x1xf32> to vector<8x32xf32>
    %144 = arith.subf %134, %143 : vector<8x32xf32>
    %145 = arith.mulf %144, %144 : vector<8x32xf32>
    %cst_59 = arith.constant dense<0.000000e+00> : vector<8xf32>
    %146 = vector.multi_reduction <add>, %145, %cst_59 [1] : vector<8x32xf32> to vector<8xf32>
    %147 = vector.shape_cast %146 : vector<8xf32> to vector<8x1xf32>
    %cst_60 = arith.constant 3.200000e+01 : f32
    %148 = vector.broadcast %cst_60 : f32 to vector<8x1xf32>
    %149 = arith.divf %147, %148 : vector<8x1xf32>
    %150 = vector.broadcast %142 : vector<8x1xf32> to vector<8x32xf32>
    %151 = arith.subf %134, %150 : vector<8x32xf32>
    %cst_61 = arith.constant 9.99999996E-13 : f32
    %152 = vector.broadcast %cst_61 : f32 to vector<8x1xf32>
    %153 = arith.addf %149, %152 : vector<8x1xf32>
    %154 = math.rsqrt %153 : vector<8x1xf32>
    %155 = vector.broadcast %154 : vector<8x1xf32> to vector<8x32xf32>
    %156 = arith.mulf %151, %155 : vector<8x32xf32>
    %157 = vector.broadcast %136 : vector<1x32xf32> to vector<8x32xf32>
    %158 = arith.mulf %156, %157 : vector<8x32xf32>
    %159 = vector.broadcast %138 : vector<1x32xf32> to vector<8x32xf32>
    %160 = arith.addf %158, %159 : vector<8x32xf32>
    %161 = arith.truncf %160 : vector<8x32xf32> to vector<8x32xbf16>
    %c1 = arith.constant 1 : index
    %c0_62 = arith.constant 0 : index
    %c0_63 = arith.constant 0 : index
    %162 = vector.load %arg3[%c1, %c0_62, %c0_63] : memref<2x32x96xbf16, #tpu.memory_space<vmem>>, vector<1x32x96xbf16>
    %163 = vector.shape_cast %162 : vector<1x32x96xbf16> to vector<32x96xbf16>
    %cst_64 = arith.constant dense<0.000000e+00> : vector<8x96xf32>
    %164 = tpu.matmul %161, %163, %cst_64 {dimension_numbers = #tpu.dot_dimension_numbers<[1], [0], [0], [1], [0, 0, 1, 1], [], []>} : vector<8x32xbf16>, vector<32x96xbf16>, vector<8x96xf32> -> vector<8x96xf32>
    %c1_65 = arith.constant 1 : index
    %c0_66 = arith.constant 0 : index
    %c0_67 = arith.constant 0 : index
    %165 = vector.load %arg4[%c1_65, %c0_66, %c0_67] : memref<2x1x96xf32, #tpu.memory_space<vmem>>, vector<1x1x96xf32>
    %166 = vector.shape_cast %165 : vector<1x1x96xf32> to vector<1x96xf32>
    %167 = vector.broadcast %166 : vector<1x96xf32> to vector<8x96xf32>
    %168 = arith.addf %164, %167 : vector<8x96xf32>
    %169 = vector.extract_strided_slice %168 {offsets = [0, 0], sizes = [8, 32], strides = [1, 1]} : vector<8x96xf32> to vector<8x32xf32>
    %170 = vector.extract_strided_slice %168 {offsets = [0, 32], sizes = [8, 32], strides = [1, 1]} : vector<8x96xf32> to vector<8x32xf32>
    %171 = vector.extract_strided_slice %168 {offsets = [0, 64], sizes = [8, 32], strides = [1, 1]} : vector<8x96xf32> to vector<8x32xf32>
    %172 = vector.extract_strided_slice %169 {offsets = [0, 0], sizes = [8, 8], strides = [1, 1]} : vector<8x32xf32> to vector<8x8xf32>
    %173 = vector.extract_strided_slice %169 {offsets = [0, 8], sizes = [8, 8], strides = [1, 1]} : vector<8x32xf32> to vector<8x8xf32>
    %174 = vector.extract_strided_slice %169 {offsets = [0, 16], sizes = [8, 8], strides = [1, 1]} : vector<8x32xf32> to vector<8x8xf32>
    %175 = vector.extract_strided_slice %169 {offsets = [0, 24], sizes = [8, 8], strides = [1, 1]} : vector<8x32xf32> to vector<8x8xf32>
    %176 = vector.shape_cast %172 : vector<8x8xf32> to vector<1x8x8xf32>
    %177 = vector.shape_cast %173 : vector<8x8xf32> to vector<1x8x8xf32>
    %178 = vector.shape_cast %174 : vector<8x8xf32> to vector<1x8x8xf32>
    %179 = vector.shape_cast %175 : vector<8x8xf32> to vector<1x8x8xf32>
    %180 = tpu.concatenate %176, %177, %178, %179 in 0 : vector<1x8x8xf32>, vector<1x8x8xf32>, vector<1x8x8xf32>, vector<1x8x8xf32> -> vector<4x8x8xf32>
    %181 = vector.extract_strided_slice %170 {offsets = [0, 0], sizes = [8, 8], strides = [1, 1]} : vector<8x32xf32> to vector<8x8xf32>
    %182 = vector.extract_strided_slice %170 {offsets = [0, 8], sizes = [8, 8], strides = [1, 1]} : vector<8x32xf32> to vector<8x8xf32>
    %183 = vector.extract_strided_slice %170 {offsets = [0, 16], sizes = [8, 8], strides = [1, 1]} : vector<8x32xf32> to vector<8x8xf32>
    %184 = vector.extract_strided_slice %170 {offsets = [0, 24], sizes = [8, 8], strides = [1, 1]} : vector<8x32xf32> to vector<8x8xf32>
    %185 = vector.shape_cast %181 : vector<8x8xf32> to vector<1x8x8xf32>
    %186 = vector.shape_cast %182 : vector<8x8xf32> to vector<1x8x8xf32>
    %187 = vector.shape_cast %183 : vector<8x8xf32> to vector<1x8x8xf32>
    %188 = vector.shape_cast %184 : vector<8x8xf32> to vector<1x8x8xf32>
    %189 = tpu.concatenate %185, %186, %187, %188 in 0 : vector<1x8x8xf32>, vector<1x8x8xf32>, vector<1x8x8xf32>, vector<1x8x8xf32> -> vector<4x8x8xf32>
    %190 = vector.extract_strided_slice %171 {offsets = [0, 0], sizes = [8, 8], strides = [1, 1]} : vector<8x32xf32> to vector<8x8xf32>
    %191 = vector.extract_strided_slice %171 {offsets = [0, 8], sizes = [8, 8], strides = [1, 1]} : vector<8x32xf32> to vector<8x8xf32>
    %192 = vector.extract_strided_slice %171 {offsets = [0, 16], sizes = [8, 8], strides = [1, 1]} : vector<8x32xf32> to vector<8x8xf32>
    %193 = vector.extract_strided_slice %171 {offsets = [0, 24], sizes = [8, 8], strides = [1, 1]} : vector<8x32xf32> to vector<8x8xf32>
    %194 = vector.shape_cast %190 : vector<8x8xf32> to vector<1x8x8xf32>
    %195 = vector.shape_cast %191 : vector<8x8xf32> to vector<1x8x8xf32>
    %196 = vector.shape_cast %192 : vector<8x8xf32> to vector<1x8x8xf32>
    %197 = vector.shape_cast %193 : vector<8x8xf32> to vector<1x8x8xf32>
    %198 = tpu.concatenate %194, %195, %196, %197 in 0 : vector<1x8x8xf32>, vector<1x8x8xf32>, vector<1x8x8xf32>, vector<1x8x8xf32> -> vector<4x8x8xf32>
    %199 = arith.truncf %180 : vector<4x8x8xf32> to vector<4x8x8xbf16>
    %200 = arith.truncf %189 : vector<4x8x8xf32> to vector<4x8x8xbf16>
    "tpu.trace_start"() <{level = 10 : i32, message = "hqd,hkd->hqk"}> : () -> ()
    %cst_68 = arith.constant dense<0.000000e+00> : vector<4x8x8xf32>
    %201 = tpu.matmul %199, %200, %cst_68 {dimension_numbers = #tpu.dot_dimension_numbers<[2], [2], [1], [1], [0, 0, 0, 1, 1, 1], [0], [0]>} : vector<4x8x8xbf16>, vector<4x8x8xbf16>, vector<4x8x8xf32> -> vector<4x8x8xf32>
    "tpu.trace_stop"() : () -> ()
    %202 = vector.shape_cast %3 : vector<1x8xf32> to vector<1x1x8xf32>
    %203 = vector.broadcast %202 : vector<1x1x8xf32> to vector<4x8x8xf32>
    %204 = arith.addf %201, %203 : vector<4x8x8xf32>
    %cst_69 = arith.constant dense<0xFF800000> : vector<4x8xf32>
    %205 = vector.multi_reduction <maximumf>, %204, %cst_69 [2] : vector<4x8x8xf32> to vector<4x8xf32>
    %206 = vector.shape_cast %205 : vector<4x8xf32> to vector<4x8x1xf32>
    %207 = vector.broadcast %206 : vector<4x8x1xf32> to vector<4x8x8xf32>
    %208 = arith.subf %204, %207 : vector<4x8x8xf32>
    %209 = math.exp %208 : vector<4x8x8xf32>
    %cst_70 = arith.constant dense<0.000000e+00> : vector<4x8xf32>
    %210 = vector.multi_reduction <add>, %209, %cst_70 [2] : vector<4x8x8xf32> to vector<4x8xf32>
    %211 = vector.shape_cast %210 : vector<4x8xf32> to vector<4x8x1xf32>
    %212 = tpu.reciprocal %211 {approx = true} : vector<4x8x1xf32> -> vector<4x8x1xf32>
    %213 = vector.broadcast %212 : vector<4x8x1xf32> to vector<4x8x8xf32>
    %214 = arith.mulf %209, %213 : vector<4x8x8xf32>
    %215 = arith.truncf %214 : vector<4x8x8xf32> to vector<4x8x8xbf16>
    %216 = arith.truncf %198 : vector<4x8x8xf32> to vector<4x8x8xbf16>
    "tpu.trace_start"() <{level = 10 : i32, message = "hqk,hkd->hqd"}> : () -> ()
    %cst_71 = arith.constant dense<0.000000e+00> : vector<4x8x8xf32>
    %217 = tpu.matmul %215, %216, %cst_71 {dimension_numbers = #tpu.dot_dimension_numbers<[2], [1], [1], [2], [0, 0, 0, 1, 1, 2], [0], [0]>} : vector<4x8x8xbf16>, vector<4x8x8xbf16>, vector<4x8x8xf32> -> vector<4x8x8xf32>
    "tpu.trace_stop"() : () -> ()
    %218 = vector.extract_strided_slice %217 {offsets = [0, 0, 0], sizes = [1, 8, 8], strides = [1, 1, 1]} : vector<4x8x8xf32> to vector<1x8x8xf32>
    %219 = vector.shape_cast %218 : vector<1x8x8xf32> to vector<8x8xf32>
    %220 = vector.extract_strided_slice %217 {offsets = [1, 0, 0], sizes = [1, 8, 8], strides = [1, 1, 1]} : vector<4x8x8xf32> to vector<1x8x8xf32>
    %221 = vector.shape_cast %220 : vector<1x8x8xf32> to vector<8x8xf32>
    %222 = vector.extract_strided_slice %217 {offsets = [2, 0, 0], sizes = [1, 8, 8], strides = [1, 1, 1]} : vector<4x8x8xf32> to vector<1x8x8xf32>
    %223 = vector.shape_cast %222 : vector<1x8x8xf32> to vector<8x8xf32>
    %224 = vector.extract_strided_slice %217 {offsets = [3, 0, 0], sizes = [1, 8, 8], strides = [1, 1, 1]} : vector<4x8x8xf32> to vector<1x8x8xf32>
    %225 = vector.shape_cast %224 : vector<1x8x8xf32> to vector<8x8xf32>
    %226 = tpu.concatenate %219, %221, %223, %225 in 1 : vector<8x8xf32>, vector<8x8xf32>, vector<8x8xf32>, vector<8x8xf32> -> vector<8x32xf32>
    %227 = arith.truncf %226 : vector<8x32xf32> to vector<8x32xbf16>
    %c1_72 = arith.constant 1 : index
    %c0_73 = arith.constant 0 : index
    %c0_74 = arith.constant 0 : index
    %228 = vector.load %arg5[%c1_72, %c0_73, %c0_74] : memref<2x32x32xbf16, #tpu.memory_space<vmem>>, vector<1x32x32xbf16>
    %229 = vector.shape_cast %228 : vector<1x32x32xbf16> to vector<32x32xbf16>
    %cst_75 = arith.constant dense<0.000000e+00> : vector<8x32xf32>
    %230 = tpu.matmul %227, %229, %cst_75 {dimension_numbers = #tpu.dot_dimension_numbers<[1], [0], [0], [1], [0, 0, 1, 1], [], []>} : vector<8x32xbf16>, vector<32x32xbf16>, vector<8x32xf32> -> vector<8x32xf32>
    %c1_76 = arith.constant 1 : index
    %c0_77 = arith.constant 0 : index
    %c0_78 = arith.constant 0 : index
    %231 = vector.load %arg6[%c1_76, %c0_77, %c0_78] : memref<2x1x32xf32, #tpu.memory_space<vmem>>, vector<1x1x32xf32>
    %232 = vector.shape_cast %231 : vector<1x1x32xf32> to vector<1x32xf32>
    %233 = vector.broadcast %232 : vector<1x32xf32> to vector<8x32xf32>
    %234 = arith.addf %230, %233 : vector<8x32xf32>
    %235 = arith.addf %160, %234 : vector<8x32xf32>
    %c1_79 = arith.constant 1 : index
    %c0_80 = arith.constant 0 : index
    %c0_81 = arith.constant 0 : index
    %236 = vector.load %arg7[%c1_79, %c0_80, %c0_81] : memref<2x1x32xf32, #tpu.memory_space<vmem>>, vector<1x1x32xf32>
    %237 = vector.shape_cast %236 : vector<1x1x32xf32> to vector<1x32xf32>
    %c1_82 = arith.constant 1 : index
    %c0_83 = arith.constant 0 : index
    %c0_84 = arith.constant 0 : index
    %238 = vector.load %arg8[%c1_82, %c0_83, %c0_84] : memref<2x1x32xf32, #tpu.memory_space<vmem>>, vector<1x1x32xf32>
    %239 = vector.shape_cast %238 : vector<1x1x32xf32> to vector<1x32xf32>
    %cst_85 = arith.constant dense<0.000000e+00> : vector<8xf32>
    %240 = vector.multi_reduction <add>, %235, %cst_85 [1] : vector<8x32xf32> to vector<8xf32>
    %241 = vector.shape_cast %240 : vector<8xf32> to vector<8x1xf32>
    %cst_86 = arith.constant 3.200000e+01 : f32
    %242 = vector.broadcast %cst_86 : f32 to vector<8x1xf32>
    %243 = arith.divf %241, %242 : vector<8x1xf32>
    %244 = vector.broadcast %243 : vector<8x1xf32> to vector<8x32xf32>
    %245 = arith.subf %235, %244 : vector<8x32xf32>
    %246 = arith.mulf %245, %245 : vector<8x32xf32>
    %cst_87 = arith.constant dense<0.000000e+00> : vector<8xf32>
    %247 = vector.multi_reduction <add>, %246, %cst_87 [1] : vector<8x32xf32> to vector<8xf32>
    %248 = vector.shape_cast %247 : vector<8xf32> to vector<8x1xf32>
    %cst_88 = arith.constant 3.200000e+01 : f32
    %249 = vector.broadcast %cst_88 : f32 to vector<8x1xf32>
    %250 = arith.divf %248, %249 : vector<8x1xf32>
    %251 = vector.broadcast %243 : vector<8x1xf32> to vector<8x32xf32>
    %252 = arith.subf %235, %251 : vector<8x32xf32>
    %cst_89 = arith.constant 9.99999996E-13 : f32
    %253 = vector.broadcast %cst_89 : f32 to vector<8x1xf32>
    %254 = arith.addf %250, %253 : vector<8x1xf32>
    %255 = math.rsqrt %254 : vector<8x1xf32>
    %256 = vector.broadcast %255 : vector<8x1xf32> to vector<8x32xf32>
    %257 = arith.mulf %252, %256 : vector<8x32xf32>
    %258 = vector.broadcast %237 : vector<1x32xf32> to vector<8x32xf32>
    %259 = arith.mulf %257, %258 : vector<8x32xf32>
    %260 = vector.broadcast %239 : vector<1x32xf32> to vector<8x32xf32>
    %261 = arith.addf %259, %260 : vector<8x32xf32>
    %262 = arith.truncf %261 : vector<8x32xf32> to vector<8x32xbf16>
    %c1_90 = arith.constant 1 : index
    %c0_91 = arith.constant 0 : index
    %c0_92 = arith.constant 0 : index
    %263 = vector.load %arg9[%c1_90, %c0_91, %c0_92] : memref<2x32x64xbf16, #tpu.memory_space<vmem>>, vector<1x32x64xbf16>
    %264 = vector.shape_cast %263 : vector<1x32x64xbf16> to vector<32x64xbf16>
    %cst_93 = arith.constant dense<0.000000e+00> : vector<8x64xf32>
    %265 = tpu.matmul %262, %264, %cst_93 {dimension_numbers = #tpu.dot_dimension_numbers<[1], [0], [0], [1], [0, 0, 1, 1], [], []>} : vector<8x32xbf16>, vector<32x64xbf16>, vector<8x64xf32> -> vector<8x64xf32>
    %c1_94 = arith.constant 1 : index
    %c0_95 = arith.constant 0 : index
    %c0_96 = arith.constant 0 : index
    %266 = vector.load %arg10[%c1_94, %c0_95, %c0_96] : memref<2x1x64xf32, #tpu.memory_space<vmem>>, vector<1x1x64xf32>
    %267 = vector.shape_cast %266 : vector<1x1x64xf32> to vector<1x64xf32>
    %268 = vector.broadcast %267 : vector<1x64xf32> to vector<8x64xf32>
    %269 = arith.addf %265, %268 : vector<8x64xf32>
    %270 = arith.mulf %269, %269 : vector<8x64xf32>
    %271 = arith.mulf %269, %270 : vector<8x64xf32>
    %cst_97 = arith.constant 4.471500e-02 : f32
    %272 = vector.broadcast %cst_97 : f32 to vector<8x64xf32>
    %273 = arith.mulf %272, %271 : vector<8x64xf32>
    %274 = arith.addf %269, %273 : vector<8x64xf32>
    %cst_98 = arith.constant 0.797884583 : f32
    %275 = vector.broadcast %cst_98 : f32 to vector<8x64xf32>
    %276 = arith.mulf %275, %274 : vector<8x64xf32>
    %277 = math.tanh %276 : vector<8x64xf32>
    %cst_99 = arith.constant 1.000000e+00 : f32
    %278 = vector.broadcast %cst_99 : f32 to vector<8x64xf32>
    %279 = arith.addf %278, %277 : vector<8x64xf32>
    %cst_100 = arith.constant 5.000000e-01 : f32
    %280 = vector.broadcast %cst_100 : f32 to vector<8x64xf32>
    %281 = arith.mulf %280, %279 : vector<8x64xf32>
    %282 = arith.mulf %269, %281 : vector<8x64xf32>
    %283 = arith.truncf %282 : vector<8x64xf32> to vector<8x64xbf16>
    %c1_101 = arith.constant 1 : index
    %c0_102 = arith.constant 0 : index
    %c0_103 = arith.constant 0 : index
    %284 = vector.load %arg11[%c1_101, %c0_102, %c0_103] : memref<2x64x32xbf16, #tpu.memory_space<vmem>>, vector<1x64x32xbf16>
    %285 = vector.shape_cast %284 : vector<1x64x32xbf16> to vector<64x32xbf16>
    %cst_104 = arith.constant dense<0.000000e+00> : vector<8x32xf32>
    %286 = tpu.matmul %283, %285, %cst_104 {dimension_numbers = #tpu.dot_dimension_numbers<[1], [0], [0], [1], [0, 0, 1, 1], [], []>} : vector<8x64xbf16>, vector<64x32xbf16>, vector<8x32xf32> -> vector<8x32xf32>
    %c1_105 = arith.constant 1 : index
    %c0_106 = arith.constant 0 : index
    %c0_107 = arith.constant 0 : index
    %287 = vector.load %arg12[%c1_105, %c0_106, %c0_107] : memref<2x1x32xf32, #tpu.memory_space<vmem>>, vector<1x1x32xf32>
    %288 = vector.shape_cast %287 : vector<1x1x32xf32> to vector<1x32xf32>
    %289 = vector.broadcast %288 : vector<1x32xf32> to vector<8x32xf32>
    %290 = arith.addf %286, %289 : vector<8x32xf32>
    %291 = arith.addf %290, %261 : vector<8x32xf32>
    %c1_108 = arith.constant 1 : index
    %c0_109 = arith.constant 0 : index
    %c0_110 = arith.constant 0 : index
    %292 = vector.load %arg13[%c1_108, %c0_109, %c0_110] : memref<2x1x32xf32, #tpu.memory_space<vmem>>, vector<1x1x32xf32>
    %293 = vector.shape_cast %292 : vector<1x1x32xf32> to vector<1x32xf32>
    %c1_111 = arith.constant 1 : index
    %c0_112 = arith.constant 0 : index
    %c0_113 = arith.constant 0 : index
    %294 = vector.load %arg14[%c1_111, %c0_112, %c0_113] : memref<2x1x32xf32, #tpu.memory_space<vmem>>, vector<1x1x32xf32>
    %295 = vector.shape_cast %294 : vector<1x1x32xf32> to vector<1x32xf32>
    %cst_114 = arith.constant dense<0.000000e+00> : vector<8xf32>
    %296 = vector.multi_reduction <add>, %291, %cst_114 [1] : vector<8x32xf32> to vector<8xf32>
    %297 = vector.shape_cast %296 : vector<8xf32> to vector<8x1xf32>
    %cst_115 = arith.constant 3.200000e+01 : f32
    %298 = vector.broadcast %cst_115 : f32 to vector<8x1xf32>
    %299 = arith.divf %297, %298 : vector<8x1xf32>
    %300 = vector.broadcast %299 : vector<8x1xf32> to vector<8x32xf32>
    %301 = arith.subf %291, %300 : vector<8x32xf32>
    %302 = arith.mulf %301, %301 : vector<8x32xf32>
    %cst_116 = arith.constant dense<0.000000e+00> : vector<8xf32>
    %303 = vector.multi_reduction <add>, %302, %cst_116 [1] : vector<8x32xf32> to vector<8xf32>
    %304 = vector.shape_cast %303 : vector<8xf32> to vector<8x1xf32>
    %cst_117 = arith.constant 3.200000e+01 : f32
    %305 = vector.broadcast %cst_117 : f32 to vector<8x1xf32>
    %306 = arith.divf %304, %305 : vector<8x1xf32>
    %307 = vector.broadcast %299 : vector<8x1xf32> to vector<8x32xf32>
    %308 = arith.subf %291, %307 : vector<8x32xf32>
    %cst_118 = arith.constant 9.99999996E-13 : f32
    %309 = vector.broadcast %cst_118 : f32 to vector<8x1xf32>
    %310 = arith.addf %306, %309 : vector<8x1xf32>
    %311 = math.rsqrt %310 : vector<8x1xf32>
    %312 = vector.broadcast %311 : vector<8x1xf32> to vector<8x32xf32>
    %313 = arith.mulf %308, %312 : vector<8x32xf32>
    %314 = vector.broadcast %293 : vector<1x32xf32> to vector<8x32xf32>
    %315 = arith.mulf %313, %314 : vector<8x32xf32>
    %316 = vector.broadcast %295 : vector<1x32xf32> to vector<8x32xf32>
    %317 = arith.addf %315, %316 : vector<8x32xf32>
    %c0_119 = arith.constant 0 : index
    %c0_120 = arith.constant 0 : index
    %c0_121 = arith.constant 0 : index
    %318 = vector.load %arg15[%c0_119, %c0_120, %c0_121] : memref<1x8x32xf32, #tpu.memory_space<vmem>>, vector<1x8x32xf32>
    %319 = vector.shape_cast %318 : vector<1x8x32xf32> to vector<8x32xf32>
    %320 = vector.shape_cast %317 : vector<8x32xf32> to vector<1x8x32xf32>
    tpu.vector_store %arg15[%c0_119, %c0_120, %c0_121], %320 {strides = array<i32>} : memref<1x8x32xf32, #tpu.memory_space<vmem>>, vector<1x8x32xf32>,
    return
  }
  func.func @transform_0(%arg0: i32) -> (i32, i32, i32) {
    %c0_i32 = arith.constant 0 : i32
    %c0_i32_0 = arith.constant 0 : i32
    %c0_i32_1 = arith.constant 0 : i32
    return %arg0, %c0_i32, %c0_i32_0 : i32, i32, i32
  }
  func.func @transform_1(%arg0: i32) -> (i32, i32, i32) {
    %c0_i32 = arith.constant 0 : i32
    %c0_i32_0 = arith.constant 0 : i32
    %c0_i32_1 = arith.constant 0 : i32
    return %arg0, %c0_i32, %c0_i32_0 : i32, i32, i32
  }
  func.func @transform_2(%arg0: i32) -> (i32, i32, i32) {
    %c0_i32 = arith.constant 0 : i32
    %c0_i32_0 = arith.constant 0 : i32
    %c0_i32_1 = arith.constant 0 : i32
    %c0_i32_2 = arith.constant 0 : i32
    return %c0_i32, %c0_i32_0, %c0_i32_1 : i32, i32, i32
  }
  func.func @transform_3(%arg0: i32) -> (i32, i32, i32) {
    %c0_i32 = arith.constant 0 : i32
    %c0_i32_0 = arith.constant 0 : i32
    %c0_i32_1 = arith.constant 0 : i32
    %c0_i32_2 = arith.constant 0 : i32
    return %c0_i32, %c0_i32_0, %c0_i32_1 : i32, i32, i32
  }
  func.func @transform_4(%arg0: i32) -> (i32, i32, i32) {
    %c0_i32 = arith.constant 0 : i32
    %c0_i32_0 = arith.constant 0 : i32
    %c0_i32_1 = arith.constant 0 : i32
    %c0_i32_2 = arith.constant 0 : i32
    return %c0_i32, %c0_i32_0, %c0_i32_1 : i32, i32, i32
  }
  func.func @transform_5(%arg0: i32) -> (i32, i32, i32) {
    %c0_i32 = arith.constant 0 : i32
    %c0_i32_0 = arith.constant 0 : i32
    %c0_i32_1 = arith.constant 0 : i32
    %c0_i32_2 = arith.constant 0 : i32
    return %c0_i32, %c0_i32_0, %c0_i32_1 : i32, i32, i32
  }
  func.func @transform_6(%arg0: i32) -> (i32, i32, i32) {
    %c0_i32 = arith.constant 0 : i32
    %c0_i32_0 = arith.constant 0 : i32
    %c0_i32_1 = arith.constant 0 : i32
    %c0_i32_2 = arith.constant 0 : i32
    return %c0_i32, %c0_i32_0, %c0_i32_1 : i32, i32, i32
  }
  func.func @transform_7(%arg0: i32) -> (i32, i32, i32) {
    %c0_i32 = arith.constant 0 : i32
    %c0_i32_0 = arith.constant 0 : i32
    %c0_i32_1 = arith.constant 0 : i32
    %c0_i32_2 = arith.constant 0 : i32
    return %c0_i32, %c0_i32_0, %c0_i32_1 : i32, i32, i32
  }
  func.func @transform_8(%arg0: i32) -> (i32, i32, i32) {
    %c0_i32 = arith.constant 0 : i32
    %c0_i32_0 = arith.constant 0 : i32
    %c0_i32_1 = arith.constant 0 : i32
    %c0_i32_2 = arith.constant 0 : i32
    return %c0_i32, %c0_i32_0, %c0_i32_1 : i32, i32, i32
  }
  func.func @transform_9(%arg0: i32) -> (i32, i32, i32) {
    %c0_i32 = arith.constant 0 : i32
    %c0_i32_0 = arith.constant 0 : i32
    %c0_i32_1 = arith.constant 0 : i32
    %c0_i32_2 = arith.constant 0 : i32
    return %c0_i32, %c0_i32_0, %c0_i32_1 : i32, i32, i32
  }
  func.func @transform_10(%arg0: i32) -> (i32, i32, i32) {
    %c0_i32 = arith.constant 0 : i32
    %c0_i32_0 = arith.constant 0 : i32
    %c0_i32_1 = arith.constant 0 : i32
    %c0_i32_2 = arith.constant 0 : i32
    return %c0_i32, %c0_i32_0, %c0_i32_1 : i32, i32, i32
  }
  func.func @transform_11(%arg0: i32) -> (i32, i32, i32) {
    %c0_i32 = arith.constant 0 : i32
    %c0_i32_0 = arith.constant 0 : i32
    %c0_i32_1 = arith.constant 0 : i32
    %c0_i32_2 = arith.constant 0 : i32
    return %c0_i32, %c0_i32_0, %c0_i32_1 : i32, i32, i32
  }
  func.func @transform_12(%arg0: i32) -> (i32, i32, i32) {
    %c0_i32 = arith.constant 0 : i32
    %c0_i32_0 = arith.constant 0 : i32
    %c0_i32_1 = arith.constant 0 : i32
    %c0_i32_2 = arith.constant 0 : i32
    return %c0_i32, %c0_i32_0, %c0_i32_1 : i32, i32, i32
  }
  func.func @transform_13(%arg0: i32) -> (i32, i32, i32) {
    %c0_i32 = arith.constant 0 : i32
    %c0_i32_0 = arith.constant 0 : i32
    %c0_i32_1 = arith.constant 0 : i32
    %c0_i32_2 = arith.constant 0 : i32
    return %c0_i32, %c0_i32_0, %c0_i32_1 : i32, i32, i32
  }
  func.func @transform_14(%arg0: i32) -> (i32, i32, i32) {
    %c0_i32 = arith.constant 0 : i32
    %c0_i32_0 = arith.constant 0 : i32
    %c0_i32_1 = arith.constant 0 : i32
    return %arg0, %c0_i32, %c0_i32_0 : i32, i32, i32
  }
}

</mosaic_0001>

<bundles_post_ra>
// kernel: tpu_custom_call.1
= control target key start
LH: loop header
LB: loop body
LE: loop exit
PB: predicated region body
PF: predicated region fallthrough
CT: control target
= control target key end

     0   :  { %s4507_s0 = inlined_call_operand.hbm [shape: f32[2,8,32], index: 0, kind: input, shape index: {}]   ;;  %s4508_s1 = inlined_call_operand.hbm [shape: f32[2,1,8], index: 1, kind: input, shape index: {}]   ;;  %s4509_s2 = inlined_call_operand.hbm [shape: bf16[2,32,96], index: 2, kind: input, shape index: {}]   ;;  %s4510_s3 = inlined_call_operand.hbm [shape: f32[2,1,96], index: 3, kind: input, shape index: {}]   ;;  %s4511_s4 = inlined_call_operand.hbm [shape: bf16[2,32,32], index: 4, kind: input, shape index: {}]   ;;  %s4512_s5 = inlined_call_operand.hbm [shape: f32[2,1,32], index: 5, kind: input, shape index: {}]   ;;  %s4513_s6 = inlined_call_operand.hbm [shape: f32[2,1,32], index: 6, kind: input, shape index: {}]   ;;  %s4514_s7 = inlined_call_operand.hbm [shape: f32[2,1,32], index: 7, kind: input, shape index: {}]   ;;  %s4515_s8 = inlined_call_operand.hbm [shape: bf16[2,32,64], index: 8, kind: input, shape index: {}]   ;;  %s4516_s9 = inlined_call_operand.hbm [shape: f32[2,1,64], index: 9, kind: input, shape index: {}]   ;;  %s4517_s10 = inlined_call_operand.hbm [shape: bf16[2,64,32], index: 10, kind: input, shape index: {}]   ;;  %s4518_s11 = inlined_call_operand.hbm [shape: f32[2,1,32], index: 11, kind: input, shape index: {}]   ;;  %s4519_s12 = inlined_call_operand.hbm [shape: f32[2,1,32], index: 12, kind: input, shape index: {}]   ;;  %s4520_s13 = inlined_call_operand.hbm [shape: f32[2,1,32], index: 13, kind: input, shape index: {}]   ;;  %s4521_s14 = inlined_call_operand.hbm [shape: f32[2,8,32], index: 14, kind: output, shape index: {}]  }
   0x1   :  { %4541 = sst [smem:[#allocation39_spill]] %s4507_s0 }
   0x2   :  { %4542 = sst [smem:[#allocation40_spill]] %s4508_s1 }
   0x3   :  { %4543 = sst [smem:[#allocation41_spill]] %s4509_s2 }
   0x4   :  { %4544 = sst [smem:[#allocation42_spill]] %s4510_s3 }
   0x5   :  { %4545 = sst [smem:[#allocation43_spill]] %s4511_s4 }
   0x6   :  { %4546 = sst [smem:[#allocation44_spill]] %s4512_s5 }
   0x7   :  { %4547 = sst [smem:[#allocation45_spill]] %s4513_s6 }
   0x8   :  { %4548 = sst [smem:[#allocation46_spill]] %s4521_s14 }
   0x9   :  { %19 = vsyncpa [#allocation3], 0 }
   0xa   :  { %21 = vsyncpa [#allocation3 + $0x1], 0 }
   0xb   :  { %22 = vsyncpa [#allocation6], 0 }
   0xc   :  { %24 = vsyncpa [#allocation6 + $0x1], 0 }
   0xd   :  { %25 = vsyncpa [#allocation9], 0 }
   0xe   :  { %26 = vsyncpa [#allocation12], 0 }
   0xf   :  { %27 = vsyncpa [#allocation15], 0 }
  0x10   :  { %28 = vsyncpa [#allocation18], 0 }
  0x11   :  { %29 = vsyncpa [#allocation21], 0 }
  0x12   :  { %30 = vsyncpa [#allocation24], 0 }
  0x13   :  { %31 = vsyncpa [#allocation4], 0 }
  0x14   :  { %33 = vsyncpa [#allocation4 + $0x1], 0  ;;  %s3750_s29 = smov 0   ;;  %s3752_s30 = smov 0  }
  0x15   :  { %s3754_s15 = smov 0   ;;  %s3756_s16 = smov 0  }
  0x16 LB: > { %4549 = sst [smem:[#allocation36_spill]] %s3632_s29  ;;  %s3646_s17 = smov [#allocation7]   ;;  %s3644_s16 = sphi %s3756_s16, %s4601_s16   ;;  %s3640_s15 = sphi %s3754_s15, %s4600_s15   ;;  %s3636_s30 = sphi %s3752_s30, %s4599_s30   ;;  %s3632_s29 = sphi %s3750_s29, %s4598_s29  }
  0x17   : > { %s386_s18 = sshll.u32 %s3646_s17, 4  ;;  %s3771_s19 = sadd.s32 4294967295, %s3644_s16   ;;  %s3776_s18 = int_to_ptr.vmem [resolvable:$true] %s386_s18 }
  0x18   : > { %4550 = sst [smem:[#allocation37_spill]] %s3771_s19  ;;  %p2575_p0 = scmp.ge.s32.totalorder %s3644_s16, 1 }
  0x19   : > { %p4531_p1 = scmp.eq.s32.totalorder %s3771_s19, 0  ;;  %p374_p2 = scmp.lt.s32.totalorder %s3644_s16, 3 }
  0x1a   : > { %s3647_s21 = smov [#allocation8]   ;;  %s3648_s24 = smov [#allocation11]  }
  0x1b   : > { %p3778_p3 = pnand %p2575_p0, %p374_p2  ;;  %s399_s22 = sshll.u32 %s3647_s21, 4  ;;  %s3791_s22 = int_to_ptr.vmem [resolvable:$true] %s399_s22 }
  0x1c   : > { %s3793_s25 = sshll.u32 %s3648_s24, 4  ;;  %s4554_s2 = sld [smem:[#allocation41_spill]]  ;;  %s426_s25 = int_to_ptr.vmem [resolvable:$true] %s3793_s25 }
  0x1d   : > { %s4551_s20 = scalar_select %p3778_p3, 1, 0 }
  0x1e   : > { %p2954_p5 = pneg %p3778_p3 }
  0x1f   : > { %4552 = sst [smem:[#allocation38_spill]] %s4551_s20 }
  0x20   : > { %p3787_p6 = pnand %p2954_p5, %p4531_p1 }
  0x22   : > { %s3150_s28 = scalar_lea.hbm %s4554_s2, 512  ;;  %p3803_p8 = pneg %p3787_p6 }
  0x23   : > { %p3151_p7 = scmp.ne.s32.totalorder %s4554_s2, %s3150_s28  ;;  %p3157_p11 = scmp.lt.u32.totalorder %s3150_s28, %s4554_s2 }
  0x25   : > { %p3153_p9 = pnand %p3803_p8, %p3151_p7 }
  0x27   : > { %p3154_p10 = pneg %p3153_p9 }
  0x29   : > { %p3159_p12 = pnand %p3157_p11, %p3154_p10 }
  0x2b   : > { %3162 = shalt.err (!%p3159_p12)
}
  0x2c   : > { %s3163_s14 = scalar_lea.vmem %s3776_s18, 512  ;;  %p3171_p5 = scmp.lt.s32.totalorder %s3776_s18, %s3776_s18 }
  0x2d   : > { %p3164_p13 = scmp.ne.s32.totalorder %s3776_s18, %s3163_s14  ;;  %p3172_p4 = scmp.lt.s32.totalorder %s3163_s14, %s3163_s14 }
  0x2f   : > { %p3166_p0 = pnand %p3164_p13, %p3803_p8  ;;  %p3173_p7 = por %p3172_p4, %p3171_p5 }
  0x31   : > { %p3167_p2 = pneg %p3166_p0 }
  0x33   : > { %p3174_p9 = pnand %p3173_p7, %p3167_p2 }
  0x35   : > { %3177 = shalt.err (!%p3174_p9)
}
  0x36   : > { %s4529_s26 = smov 64   ;;  %s4533_s20 = smov 4  }
  0x37   : > { %2957 = dma.hbm_to_vmem [thread:$0]  (!%p3787_p6), %s4554_s2, 512, %s3776_s18, [#allocation6], %s4529_s26, %s4529_s26, %s4533_s20  }
  0x38   : > { %s4556_s3 = sld [smem:[#allocation42_spill]] }
  0x3e   : > { %s3178_s14 = scalar_lea.hbm %s4556_s3, 32 }
  0x3f   : > { %p3179_p4 = scmp.ne.s32.totalorder %s4556_s3, %s3178_s14  ;;  %p3185_p12 = scmp.lt.u32.totalorder %s3178_s14, %s4556_s3 }
  0x41   : > { %p3181_p10 = pnand %p3179_p4, %p3803_p8 }
  0x43   : > { %p3182_p11 = pneg %p3181_p10 }
  0x45   : > { %p3187_p13 = pnand %p3185_p12, %p3182_p11 }
  0x47   : > { %3190 = shalt.err (!%p3187_p13)
}
  0x48   : > { %s3191_s18 = scalar_lea.vmem %s3791_s22, 32  ;;  %p3199_p7 = scmp.lt.s32.totalorder %s3791_s22, %s3791_s22 }
  0x49   : > { %p3192_p0 = scmp.ne.s32.totalorder %s3791_s22, %s3191_s18  ;;  %p3200_p9 = scmp.lt.s32.totalorder %s3191_s18, %s3191_s18 }
  0x4b   : > { %p3194_p2 = pnand %p3192_p0, %p3803_p8  ;;  %p3201_p4 = por %p3200_p9, %p3199_p7 }
  0x4d   : > { %p3195_p5 = pneg %p3194_p2 }
  0x4f   : > { %p3202_p10 = pnand %p3201_p4, %p3195_p5 }
  0x51   : > { %3205 = shalt.err (!%p3202_p10)
}
  0x52   : > { %s4535_s0 = smov 16   ;;  %s4537_s1 = smov 1  }
  0x53   : > { %2960 = dma.hbm_to_vmem [thread:$0]  (!%p3787_p6), %s4556_s3, 32, %s3791_s22, [#allocation9], %s4535_s0, %s4535_s0, %s4537_s1  }
  0x54   : > { %s4557_s5 = sld [smem:[#allocation44_spill]] }
  0x5a   : > { %s3206_s17 = scalar_lea.hbm %s4557_s5, 32 }
  0x5b   : > { %p3207_p11 = scmp.ne.s32.totalorder %s4557_s5, %s3206_s17  ;;  %p3213_p0 = scmp.lt.u32.totalorder %s3206_s17, %s4557_s5 }
  0x5d   : > { %p3209_p12 = pnand %p3207_p11, %p3803_p8 }
  0x5f   : > { %p3210_p13 = pneg %p3209_p12 }
  0x61   : > { %p3215_p2 = pnand %p3213_p0, %p3210_p13 }
  0x63   : > { %3218 = shalt.err (!%p3215_p2)
}
  0x64   : > { %s3219_s29 = scalar_lea.vmem %s426_s25, 32  ;;  %p3227_p4 = scmp.lt.s32.totalorder %s426_s25, %s426_s25 }
  0x65   : > { %p3220_p5 = scmp.ne.s32.totalorder %s426_s25, %s3219_s29  ;;  %p3228_p10 = scmp.lt.s32.totalorder %s3219_s29, %s3219_s29 }
  0x67   : > { %p3222_p7 = pnand %p3220_p5, %p3803_p8  ;;  %p3229_p1 = por %p3228_p10, %p3227_p4 }
  0x69   : > { %p3223_p9 = pneg %p3222_p7 }
  0x6b   : > { %p3230_p3 = pnand %p3229_p1, %p3223_p9 }
  0x6d   : > { %3233 = shalt.err (!%p3230_p3)
}
  0x6e   : > { %2966 = dma.hbm_to_vmem [thread:$0]  (!%p3787_p6), %s4557_s5, 32, %s426_s25, [#allocation12], %s4535_s0, %s4535_s0, %s4537_s1  }
  0x6f   : > { %s3653_s19 = smov [#allocation14]   ;;  %s3654_s28 = smov [#allocation17]  }
  0x70   : > { %s451_s27 = sshll.u32 %s3653_s19, 4  ;;  %s477_s17 = sshll.u32 %s3654_s28, 4  ;;  %s452_s27 = int_to_ptr.vmem [resolvable:$true] %s451_s27  ;;  %s478_s17 = int_to_ptr.vmem [resolvable:$true] %s477_s17 }
  0x71   : > { %s3234_s18 = scalar_lea.hbm %s4514_s7, 32 }
  0x72   : > { %p3235_p1 = scmp.ne.s32.totalorder %s4514_s7, %s3234_s18  ;;  %p3241_p12 = scmp.lt.u32.totalorder %s3234_s18, %s4514_s7 }
  0x74   : > { %p3237_p3 = pnand %p3235_p1, %p3803_p8 }
  0x76   : > { %p3238_p11 = pneg %p3237_p3 }
  0x78   : > { %p3243_p13 = pnand %p3241_p12, %p3238_p11 }
  0x7a   : > { %3246 = shalt.err (!%p3243_p13)
}
  0x7b   : > { %s3247_s25 = scalar_lea.vmem %s452_s27, 32  ;;  %p3255_p7 = scmp.lt.s32.totalorder %s452_s27, %s452_s27 }
  0x7c   : > { %p3248_p0 = scmp.ne.s32.totalorder %s452_s27, %s3247_s25  ;;  %p3256_p9 = scmp.lt.s32.totalorder %s3247_s25, %s3247_s25 }
  0x7e   : > { %p3250_p2 = pnand %p3248_p0, %p3803_p8  ;;  %p3257_p4 = por %p3256_p9, %p3255_p7 }
  0x80   : > { %p3251_p5 = pneg %p3250_p2 }
  0x82   : > { %p3258_p10 = pnand %p3257_p4, %p3251_p5 }
  0x84   : > { %3261 = shalt.err (!%p3258_p10)
}
  0x85   : > { %2972 = dma.hbm_to_vmem [thread:$0]  (!%p3787_p6), %s4514_s7, 32, %s452_s27, [#allocation15], %s4535_s0, %s4535_s0, %s4537_s1  }
  0x86   : > { %s3262_s28 = scalar_lea.hbm %s4516_s9, 32 }
  0x87   : > { %p3263_p1 = scmp.ne.s32.totalorder %s4516_s9, %s3262_s28  ;;  %p3269_p12 = scmp.lt.u32.totalorder %s3262_s28, %s4516_s9 }
  0x89   : > { %p3265_p3 = pnand %p3263_p1, %p3803_p8 }
  0x8b   : > { %p3266_p11 = pneg %p3265_p3 }
  0x8d   : > { %p3271_p13 = pnand %p3269_p12, %p3266_p11 }
  0x8f   : > { %3274 = shalt.err (!%p3271_p13)
}
  0x90   : > { %s3275_s22 = scalar_lea.vmem %s478_s17, 32  ;;  %p3283_p7 = scmp.lt.s32.totalorder %s478_s17, %s478_s17 }
  0x91   : > { %p3276_p0 = scmp.ne.s32.totalorder %s478_s17, %s3275_s22  ;;  %p3284_p9 = scmp.lt.s32.totalorder %s3275_s22, %s3275_s22 }
  0x93   : > { %p3278_p2 = pnand %p3276_p0, %p3803_p8  ;;  %p3285_p4 = por %p3284_p9, %p3283_p7 }
  0x95   : > { %p3279_p5 = pneg %p3278_p2 }
  0x97   : > { %p3286_p10 = pnand %p3285_p4, %p3279_p5 }
  0x99   : > { %3289 = shalt.err (!%p3286_p10)
}
  0x9a   : > { %2978 = dma.hbm_to_vmem [thread:$0]  (!%p3787_p6), %s4516_s9, 32, %s478_s17, [#allocation18], %s4535_s0, %s4535_s0, %s4537_s1  }
  0x9b   : > { %s3655_s2 = smov [#allocation20]   ;;  %s3656_s26 = smov [#allocation10]  }
  0x9c   : > { %s503_s20 = sshll.u32 %s3655_s2, 4  ;;  %s412_s19 = sshll.u32 %s3656_s26, 4  ;;  %s504_s20 = int_to_ptr.vmem [resolvable:$true] %s503_s20  ;;  %s413_s19 = int_to_ptr.vmem [resolvable:$true] %s412_s19 }
  0x9d   : > { %s3290_s14 = scalar_lea.hbm %s4518_s11, 32 }
  0x9e   : > { %p3291_p1 = scmp.ne.s32.totalorder %s4518_s11, %s3290_s14  ;;  %p3297_p12 = scmp.lt.u32.totalorder %s3290_s14, %s4518_s11 }
  0xa0   : > { %p3293_p3 = pnand %p3291_p1, %p3803_p8 }
  0xa2   : > { %p3294_p11 = pneg %p3293_p3 }
  0xa4   : > { %p3299_p13 = pnand %p3297_p12, %p3294_p11 }
  0xa6   : > { %3302 = shalt.err (!%p3299_p13)
}
  0xa7   : > { %s3303_s17 = scalar_lea.vmem %s504_s20, 32  ;;  %p3311_p7 = scmp.lt.s32.totalorder %s504_s20, %s504_s20 }
  0xa8   : > { %p3304_p0 = scmp.ne.s32.totalorder %s504_s20, %s3303_s17  ;;  %p3312_p9 = scmp.lt.s32.totalorder %s3303_s17, %s3303_s17 }
  0xaa   : > { %p3306_p2 = pnand %p3304_p0, %p3803_p8  ;;  %p3313_p4 = por %p3312_p9, %p3311_p7 }
  0xac   : > { %p3307_p5 = pneg %p3306_p2 }
  0xae   : > { %p3314_p10 = pnand %p3313_p4, %p3307_p5 }
  0xb0   : > { %3317 = shalt.err (!%p3314_p10)
}
  0xb1   : > { %2984 = dma.hbm_to_vmem [thread:$0]  (!%p3787_p6), %s4518_s11, 32, %s504_s20, [#allocation21], %s4535_s0, %s4535_s0, %s4537_s1  }
  0xb2   : > { %s4558_s4 = sld [smem:[#allocation43_spill]] }
  0xb8   : > { %s3318_s24 = scalar_lea.hbm %s4558_s4, 512 }
  0xb9   : > { %p3319_p1 = scmp.ne.s32.totalorder %s4558_s4, %s3318_s24  ;;  %p3325_p12 = scmp.lt.u32.totalorder %s3318_s24, %s4558_s4 }
  0xbb   : > { %p3321_p3 = pnand %p3319_p1, %p3803_p8 }
  0xbd   : > { %p3322_p11 = pneg %p3321_p3 }
  0xbf   : > { %p3327_p13 = pnand %p3325_p12, %p3322_p11 }
  0xc1   : > { %3330 = shalt.err (!%p3327_p13)
}
  0xc2   : > { %s3331_s27 = scalar_lea.vmem %s413_s19, 512  ;;  %p3339_p7 = scmp.lt.s32.totalorder %s413_s19, %s413_s19 }
  0xc3   : > { %p3332_p0 = scmp.ne.s32.totalorder %s413_s19, %s3331_s27  ;;  %p3340_p9 = scmp.lt.s32.totalorder %s3331_s27, %s3331_s27 }
  0xc5   : > { %p3334_p2 = pnand %p3332_p0, %p3803_p8  ;;  %p3341_p4 = por %p3340_p9, %p3339_p7 }
  0xc7   : > { %p3335_p5 = pneg %p3334_p2 }
  0xc9   : > { %p3342_p10 = pnand %p3341_p4, %p3335_p5 }
  0xcb   : > { %3345 = shalt.err (!%p3342_p10)
}
  0xcc   : > { %s4559_s20 = smov 4   ;;  %s4560_s17 = smov 64  }
  0xcd   : > { %2963 = dma.hbm_to_vmem [thread:$0]  (!%p3787_p6), %s4558_s4, 512, %s413_s19, [#allocation9], %s4560_s17, %s4560_s17, %s4559_s20  }
  0xce   : > { %s3657_s26 = smov [#allocation13]   ;;  %s3658_s24 = smov [#allocation16]  }
  0xcf   : > { %s438_s28 = sshll.u32 %s3657_s26, 4  ;;  %s464_s14 = sshll.u32 %s3658_s24, 4  ;;  %s439_s28 = int_to_ptr.vmem [resolvable:$true] %s438_s28  ;;  %s465_s14 = int_to_ptr.vmem [resolvable:$true] %s464_s14 }
  0xd0   : > { %s4561_s6 = sld [smem:[#allocation45_spill]] }
  0xd6   : > { %s3346_s22 = scalar_lea.hbm %s4561_s6, 32 }
  0xd7   : > { %p3347_p1 = scmp.ne.s32.totalorder %s4561_s6, %s3346_s22  ;;  %p3353_p12 = scmp.lt.u32.totalorder %s3346_s22, %s4561_s6 }
  0xd9   : > { %p3349_p3 = pnand %p3347_p1, %p3803_p8 }
  0xdb   : > { %p3350_p11 = pneg %p3349_p3 }
  0xdd   : > { %p3355_p13 = pnand %p3353_p12, %p3350_p11 }
  0xdf   : > { %3358 = shalt.err (!%p3355_p13)
}
  0xe0   : > { %s3359_s19 = scalar_lea.vmem %s439_s28, 32  ;;  %p3367_p7 = scmp.lt.s32.totalorder %s439_s28, %s439_s28 }
  0xe1   : > { %p3360_p0 = scmp.ne.s32.totalorder %s439_s28, %s3359_s19  ;;  %p3368_p9 = scmp.lt.s32.totalorder %s3359_s19, %s3359_s19 }
  0xe3   : > { %p3362_p2 = pnand %p3360_p0, %p3803_p8  ;;  %p3369_p4 = por %p3368_p9, %p3367_p7 }
  0xe5   : > { %p3363_p5 = pneg %p3362_p2 }
  0xe7   : > { %p3370_p10 = pnand %p3369_p4, %p3363_p5 }
  0xe9   : > { %3373 = shalt.err (!%p3370_p10)
}
  0xea   : > { %s4562_s0 = smov 1   ;;  %s4563_s2 = smov 16  }
  0xeb   : > { %2969 = dma.hbm_to_vmem [thread:$0]  (!%p3787_p6), %s4561_s6, 32, %s439_s28, [#allocation12], %s4563_s2, %s4563_s2, %s4562_s0  }
  0xec   : > { %s3374_s29 = scalar_lea.hbm %s4515_s8, 512 }
  0xed   : > { %p3375_p1 = scmp.ne.s32.totalorder %s4515_s8, %s3374_s29  ;;  %p3381_p12 = scmp.lt.u32.totalorder %s3374_s29, %s4515_s8 }
  0xef   : > { %p3377_p3 = pnand %p3375_p1, %p3803_p8 }
  0xf1   : > { %p3378_p11 = pneg %p3377_p3 }
  0xf3   : > { %p3383_p13 = pnand %p3381_p12, %p3378_p11 }
  0xf5   : > { %3386 = shalt.err (!%p3383_p13)
}
  0xf6   : > { %s3387_s1 = scalar_lea.vmem %s465_s14, 512  ;;  %p3395_p7 = scmp.lt.s32.totalorder %s465_s14, %s465_s14 }
  0xf7   : > { %p3388_p0 = scmp.ne.s32.totalorder %s465_s14, %s3387_s1  ;;  %p3396_p9 = scmp.lt.s32.totalorder %s3387_s1, %s3387_s1 }
  0xf9   : > { %p3390_p2 = pnand %p3388_p0, %p3803_p8  ;;  %p3397_p4 = por %p3396_p9, %p3395_p7 }
  0xfb   : > { %p3391_p5 = pneg %p3390_p2 }
  0xfd   : > { %p3398_p10 = pnand %p3397_p4, %p3391_p5 }
  0xff   : > { %3401 = shalt.err (!%p3398_p10)
}
 0x100   : > { %2975 = dma.hbm_to_vmem [thread:$0]  (!%p3787_p6), %s4515_s8, 512, %s465_s14, [#allocation15], %s4560_s17, %s4560_s17, %s4559_s20  }
 0x101   : > { %s3659_s24 = smov [#allocation19]   ;;  %s3660_s29 = smov [#allocation22]  }
 0x102   : > { %s490_s18 = sshll.u32 %s3659_s24, 4  ;;  %s516_s22 = sshll.u32 %s3660_s29, 4  ;;  %s491_s18 = int_to_ptr.vmem [resolvable:$true] %s490_s18  ;;  %s517_s22 = int_to_ptr.vmem [resolvable:$true] %s516_s22 }
 0x103   : > { %s3402_s19 = scalar_lea.hbm %s4517_s10, 1024 }
 0x104   : > { %p3403_p1 = scmp.ne.s32.totalorder %s4517_s10, %s3402_s19  ;;  %p3409_p12 = scmp.lt.u32.totalorder %s3402_s19, %s4517_s10 }
 0x106   : > { %p3405_p3 = pnand %p3403_p1, %p3803_p8 }
 0x108   : > { %p3406_p11 = pneg %p3405_p3 }
 0x10a   : > { %p3411_p13 = pnand %p3409_p12, %p3406_p11 }
 0x10c   : > { %3414 = shalt.err (!%p3411_p13)
}
 0x10d   : > { %s3415_s14 = scalar_lea.vmem %s491_s18, 1024  ;;  %p3423_p7 = scmp.lt.s32.totalorder %s491_s18, %s491_s18 }
 0x10e   : > { %p3416_p0 = scmp.ne.s32.totalorder %s491_s18, %s3415_s14  ;;  %p3424_p9 = scmp.lt.s32.totalorder %s3415_s14, %s3415_s14 }
 0x110   : > { %p3418_p2 = pnand %p3416_p0, %p3803_p8  ;;  %p3425_p4 = por %p3424_p9, %p3423_p7 }
 0x112   : > { %p3419_p5 = pneg %p3418_p2 }
 0x114   : > { %p3426_p10 = pnand %p3425_p4, %p3419_p5 }
 0x116   : > { %3429 = shalt.err (!%p3426_p10)
}
 0x117   : > { %2981 = dma.hbm_to_vmem [thread:$0]  (!%p3787_p6), %s4517_s10, 1024, %s491_s18, [#allocation18], %s4560_s17, %s4560_s17, %s4559_s20  }
 0x118   : > { %s3430_s29 = scalar_lea.hbm %s4519_s12, 32 }
 0x119   : > { %p3431_p1 = scmp.ne.s32.totalorder %s4519_s12, %s3430_s29  ;;  %p3437_p12 = scmp.lt.u32.totalorder %s3430_s29, %s4519_s12 }
 0x11b   : > { %p3433_p3 = pnand %p3431_p1, %p3803_p8 }
 0x11d   : > { %p3434_p11 = pneg %p3433_p3 }
 0x11f   : > { %p3439_p13 = pnand %p3437_p12, %p3434_p11 }
 0x121   : > { %3442 = shalt.err (!%p3439_p13)
}
 0x122   : > { %s3443_s28 = scalar_lea.vmem %s517_s22, 32  ;;  %p3451_p7 = scmp.lt.s32.totalorder %s517_s22, %s517_s22 }
 0x123   : > { %p3444_p0 = scmp.ne.s32.totalorder %s517_s22, %s3443_s28  ;;  %p3452_p9 = scmp.lt.s32.totalorder %s3443_s28, %s3443_s28 }
 0x125   : > { %p3446_p2 = pnand %p3444_p0, %p3803_p8  ;;  %p3453_p4 = por %p3452_p9, %p3451_p7 }
 0x127   : > { %p3447_p5 = pneg %p3446_p2 }
 0x129   : > { %p3454_p10 = pnand %p3453_p4, %p3447_p5 }
 0x12b   : > { %3457 = shalt.err (!%p3454_p10)
}
 0x12c   : > { %2987 = dma.hbm_to_vmem [thread:$0]  (!%p3787_p6), %s4519_s12, 32, %s517_s22, [#allocation21], %s4563_s2, %s4563_s2, %s4562_s0  }
 0x12d   : > { %s3661_s18 = smov [#allocation23]   ;;  %s3458_s26 = scalar_lea.hbm %s4520_s13, 32 }
 0x12e   : > { %s529_s14 = sshll.u32 %s3661_s18, 4  ;;  %p3459_p1 = scmp.ne.s32.totalorder %s4520_s13, %s3458_s26  ;;  %s530_s14 = int_to_ptr.vmem [resolvable:$true] %s529_s14 }
 0x12f   : > { %p3465_p12 = scmp.lt.u32.totalorder %s3458_s26, %s4520_s13 }
 0x130   : > { %p3461_p3 = pnand %p3459_p1, %p3803_p8 }
 0x132   : > { %p3462_p11 = pneg %p3461_p3 }
 0x134   : > { %p3467_p13 = pnand %p3465_p12, %p3462_p11 }
 0x136   : > { %3470 = shalt.err (!%p3467_p13)
}
 0x137   : > { %s3471_s22 = scalar_lea.vmem %s530_s14, 32  ;;  %p3479_p7 = scmp.lt.s32.totalorder %s530_s14, %s530_s14 }
 0x138   : > { %p3472_p0 = scmp.ne.s32.totalorder %s530_s14, %s3471_s22  ;;  %p3480_p9 = scmp.lt.s32.totalorder %s3471_s22, %s3471_s22 }
 0x13a   : > { %p3474_p2 = pnand %p3472_p0, %p3803_p8  ;;  %p3481_p4 = por %p3480_p9, %p3479_p7 }
 0x13c   : > { %p3475_p5 = pneg %p3474_p2 }
 0x13e   : > { %p3482_p10 = pnand %p3481_p4, %p3475_p5 }
 0x140   : > { %3485 = shalt.err (!%p3482_p10)
}
 0x141   : > { %s4564_s21 = sld [smem:[#allocation36_spill]]  ;;  %s4565_s28 = sld [smem:[#allocation37_spill]] }
 0x142   : > { %2990 = dma.hbm_to_vmem [thread:$0]  (!%p3787_p6), %s4520_s13, 32, %s530_s14, [#allocation24], %s4563_s2, %s4563_s2, %s4562_s0  }
 0x143   : > { %s2574_s23 = sadd.s32 4294967294, %s3644_s16   ;;  %s4066_s20 = sadd.s32 1, %s3644_s16  }
 0x144   : > { %s43_s17 = ssub.s32 %s3644_s16, %s4066_s20  ;;  %s46_s18 = sadd.s32 1, %s3640_s15 }
 0x145   : > { %p44_p8 = scmp.eq.s32.totalorder %s43_s17, 0  ;;  %p53_p1 = scmp.ne.s32.totalorder %s3640_s15, %s3636_s30 }
 0x146   : > { %p54_p3 = scmp.eq.s32.totalorder %s3644_s16, 0  ;;  %p367_p2 = scmp.eq.s32.totalorder %s2574_s23, 1 }
 0x147   : > { %p59_p11 = scmp.ne.s32.totalorder %s3636_s30, %s4564_s21  ;;  %p4567_p13 = scmp.eq.s32.totalorder %s4565_s28, 0 }
 0x148   : > { %s4077_s3 = scalar_select %p44_p8, %s3640_s15, %s46_s18  }
 0x149   : > { %p4079_p12 = por %p54_p3, %p53_p1  ;;  %p4085_p6 = por %p4567_p13, %p59_p11 }
 0x14a   : > { %p361_p0 = scmp.eq.s32.totalorder %s4565_s28, 1  ;;  %p3014_p5 = scmp.lt.s32.totalorder %s3644_s16, 2 }
 0x14b   : > { %s4568_s0 = scalar_select %p4085_p6, 1, 0 }
 0x14c   : > { %s4092_s2 = sand.u32 1, %s3640_s15   ;;  %p4094_p7 = por %p361_p0, %p53_p1 }
 0x14d   : > { %p4098_p9 = por %p367_p2, %p59_p11  ;;  %s2589_s24 = sshll.u32 %s4092_s2, 3 }
 0x14e   : > { %s4569_s14 = scalar_select %p4094_p7, 1, 0 }
 0x14f   : > { %s4570_s26 = scalar_select %p4098_p9, 1, 0 }
 0x150   : > { %s2590_s29 = sshll.u32 %s3644_s16, 7  ;;  %s4571_s22 = sld [smem:[#allocation39_spill]] }
 0x151   : > { %s547_s1 = scalar_lea.vmem [#allocation2], %s2589_s24  ;;  %p4113_p4 = pnand %p3014_p5, %p4079_p12 }
 0x152   : > { %s554_s21 = sshll.u32 %s547_s1, 4  ;;  %s544_s17 = scalar_lea.sflag [#allocation3], %s4092_s2  ;;  %s4109_s21 = int_to_ptr.vmem [resolvable:$true] %s554_s21 }
 0x153   : > { %p3488_p8 = pneg %p4113_p4 }
 0x156   : > { %s4107_s19 = scalar_lea.hbm %s4571_s22, %s2590_s29  ;;  %s3491_s4 = scalar_lea.hbm %s4571_s22, 256 }
 0x157   : > { %s3486_s18 = scalar_lea.hbm %s4107_s19, 128  ;;  %p3492_p11 = scmp.lt.u32.totalorder %s4107_s19, %s4571_s22 }
 0x158   : > { %p3487_p10 = scmp.ne.s32.totalorder %s4107_s19, %s3486_s18  ;;  %p3493_p12 = scmp.lt.u32.totalorder %s3491_s4, %s3486_s18 }
 0x159   : > { %p3495_p0 = scmp.lt.u32.totalorder %s3486_s18, %s4107_s19 }
 0x15a   : > { %p3489_p1 = pnand %p3488_p8, %p3487_p10  ;;  %p3494_p13 = por %p3493_p12, %p3492_p11 }
 0x15c   : > { %p3490_p3 = pneg %p3489_p1  ;;  %p3496_p2 = por %p3495_p0, %p3494_p13 }
 0x15e   : > { %p3497_p5 = pnand %p3496_p2, %p3490_p3 }
 0x160   : > { %3500 = shalt.err (!%p3497_p5)
}
 0x161   : > { %s3501_s1 = scalar_lea.vmem %s4109_s21, 128  ;;  %s3662_s24 = smov [#allocation2]  }
 0x162   : > { %p3502_p10 = scmp.ne.s32.totalorder %s4109_s21, %s3501_s1  ;;  %s3506_s29 = sshll.u32 %s3662_s24, 4  ;;  %s3507_s29 = int_to_ptr.vmem [resolvable:$false] %s3506_s29 }
 0x163   : > { %s3508_s27 = scalar_lea.vmem %s3507_s29, 256  ;;  %p3509_p7 = scmp.lt.s32.totalorder %s4109_s21, %s3507_s29 }
 0x164   : > { %p3504_p1 = pnand %p3502_p10, %p3488_p8  ;;  %p3510_p11 = scmp.lt.s32.totalorder %s3508_s27, %s3501_s1 }
 0x166   : > { %p3505_p9 = pneg %p3504_p1  ;;  %p3511_p12 = por %p3510_p11, %p3509_p7 }
 0x168   : > { %p3512_p13 = pnand %p3511_p12, %p3505_p9 }
 0x16a   : > { %3515 = shalt.err (!%p3512_p13)
}
 0x16b   : > { %2994 = dma.hbm_to_vmem [thread:$0]  (!%p4113_p4), %s4107_s19, 128, %s4109_s21, %s544_s17  }
 0x16c   : > { %s2591_s18 = sshll.u32 %s3644_s16, 4  ;;  %s564_s4 = scalar_lea.vmem [#allocation5], %s4092_s2 }
 0x16d   : > { %s571_s25 = sshll.u32 %s564_s4, 4  ;;  %s4573_s5 = sld [smem:[#allocation40_spill]]  ;;  %s572_s25 = int_to_ptr.vmem [resolvable:$true] %s571_s25 }
 0x16e   : > { %s4574_s1 = sand.u32 1, %s3644_s16  }
 0x16f   : > { %s562_s27 = scalar_lea.sflag [#allocation6], %s4574_s1 }
 0x173   : > { %s4149_s29 = scalar_lea.hbm %s4573_s5, %s2591_s18  ;;  %s3521_s21 = scalar_lea.hbm %s4573_s5, 32 }
 0x174   : > { %s3516_s6 = scalar_lea.hbm %s4149_s29, 16  ;;  %p3522_p0 = scmp.lt.u32.totalorder %s4149_s29, %s4573_s5 }
 0x175   : > { %p3517_p7 = scmp.ne.s32.totalorder %s4149_s29, %s3516_s6  ;;  %p3523_p2 = scmp.lt.u32.totalorder %s3521_s21, %s3516_s6 }
 0x176   : > { %p3525_p10 = scmp.lt.u32.totalorder %s3516_s6, %s4149_s29 }
 0x177   : > { %p3519_p9 = pnand %p3517_p7, %p3488_p8  ;;  %p3524_p5 = por %p3523_p2, %p3522_p0 }
 0x179   : > { %p3520_p3 = pneg %p3519_p9  ;;  %p3526_p1 = por %p3525_p10, %p3524_p5 }
 0x17b   : > { %p3527_p11 = pnand %p3526_p1, %p3520_p3 }
 0x17d   : > { %3530 = shalt.err (!%p3527_p11)
}
 0x17e   : > { %s3531_s18 = scalar_lea.vmem %s572_s25, 16  ;;  %s3663_s4 = smov [#allocation5]  }
 0x17f   : > { %p3532_p12 = scmp.ne.s32.totalorder %s572_s25, %s3531_s18  ;;  %s3536_s24 = sshll.u32 %s3663_s4, 4  ;;  %s3537_s24 = int_to_ptr.vmem [resolvable:$false] %s3536_s24 }
 0x180   : > { %s3538_s1 = scalar_lea.vmem %s3537_s24, 32  ;;  %p3539_p9 = scmp.lt.s32.totalorder %s572_s25, %s3537_s24 }
 0x181   : > { %p3534_p13 = pnand %p3532_p12, %p3488_p8  ;;  %p3540_p6 = scmp.lt.s32.totalorder %s3538_s1, %s3531_s18 }
 0x183   : > { %p3535_p7 = pneg %p3534_p13  ;;  %p3541_p0 = por %p3540_p6, %p3539_p9 }
 0x185   : > { %p3542_p2 = pnand %p3541_p0, %p3535_p7 }
 0x187   : > { %3545 = shalt.err (!%p3542_p2)
}
 0x188   : > { %2997 = dma.hbm_to_vmem [thread:$0]  (!%p4113_p4), %s4149_s29, 16, %s572_s25, %s562_s27  }
 0x189   : > { %s4575_s6 = sld [smem:[#allocation38_spill]] }
 0x18f   : > { %p4576_p3 = scmp.ne.s32.totalorder %s4575_s6, 0 }
 0x190   : > { %s4175_s2 = sand.u32 (!%p4576_p3), 1, %s3636_s30   ;;  %p4577_p6 = scmp.ne.s32.totalorder (!%p4576_p3), %s4568_s0, 0 }
 0x191   : > { %580 = sbr.rel (%p4576_p3) target bundleno = 5715 (0x1653), region = 76  ;;  %s2593_s19 = sshll.u32 (!%p4576_p3), %s4175_s2, 3 }
 0x192   : > { %s583_s21 = scalar_lea.sflag (!%p4576_p3), [#allocation3], %s4175_s2  ;;  %s4181_s23 = scalar_lea.vmem (!%p4576_p3), [#allocation2], %s2593_s19 }
 0x198   : > { %3591 = dma.done.wait (%p4577_p6), %s583_s21, 128  }
 0x199   : > { %3593 = vsyncadd (%p4577_p6), %s583_s21, 4294967168  ;;  %s4578_s28 = sld [smem:[#allocation37_spill]]  ;;  %s594_s27 = scalar_lea.vmem [#allocation5], %s4175_s2 }
 0x19f   : > { %s591_s25 = sand.u32 1, %s4578_s28  }
 0x1a0   : > { %s592_s29 = scalar_lea.sflag [#allocation6], %s591_s25 }
 0x1a1   : > { %3595 = dma.done.wait (%p4577_p6), %s592_s29, 16  }
 0x1a2   : > { %3597 = vsyncadd (%p4577_p6), %s592_s29, 4294967280  ;;  %p4579_p4 = scmp.eq.s32.totalorder %s4578_s28, 0 }
 0x1a4   : > { %3599 = dma.done.wait (%p4579_p4), [#allocation6], 512   ;;  %p4580_p8 = pmov %p4579_p4 }
 0x1a5   : > { %p4581_p5 = pmov %p4579_p4 }
 0x1a6   : > { %3601 = vsyncadd (%p4580_p8), [#allocation6], 4294966784 }
 0x1a7   : > { %3603 = dma.done.wait (%p4581_p5), [#allocation9], 544   ;;  %p4582_p10 = pmov %p4579_p4 }
 0x1a8   : > { %p4583_p1 = pmov %p4579_p4 }
 0x1a9   : > { %3605 = vsyncadd (%p4582_p10), [#allocation9], 4294966752 }
 0x1aa   : > { %3607 = dma.done.wait (%p4583_p1), [#allocation12], 64   ;;  %p4584_p11 = pmov %p4583_p1 }
 0x1ab   : > { %p4585_p12 = pmov %p4583_p1 }
 0x1ac   : > { %3609 = vsyncadd (%p4584_p11), [#allocation12], 4294967232 }
 0x1ad   : > { %3611 = dma.done.wait (%p4585_p12), [#allocation15], 544   ;;  %p4586_p13 = pmov %p4583_p1 }
 0x1ae   : > { %p4587_p7 = pmov %p4583_p1 }
 0x1af   : > { %3613 = vsyncadd (%p4586_p13), [#allocation15], 4294966752 }
 0x1b0   : > { %3615 = dma.done.wait (%p4587_p7), [#allocation18], 1056   ;;  %p4588_p9 = pmov %p4583_p1 }
 0x1b1   : > { %p4589_p0 = pmov %p4583_p1 }
 0x1b2   : > { %3617 = vsyncadd (%p4588_p9), [#allocation18], 4294966240 }
 0x1b3   : > { %3619 = dma.done.wait (%p4589_p0), [#allocation21], 64   ;;  %p4590_p2 = pmov %p4589_p0 }
 0x1b4   : > { %p4591_p3 = pmov %p4589_p0 }
 0x1b5   : > { %3621 = vsyncadd (%p4590_p2), [#allocation21], 4294967232 }
 0x1b6   : > { %3623 = dma.done.wait (%p4591_p3), [#allocation24], 32   ;;  %p4592_p6 = pmov %p4589_p0 }
 0x1b7   : > { %v3664_v0 = vmov 0.0   ;;  %vm3665_vm0 = vmmov 0   ;;  %v3086_v1 = vld [vmem:[#allocation7] sm:$0xff]   ;;  %v3087_v2 = vld [vmem:[#allocation7 + $0x8] sm:$0xff]   ;;  %vm718_vm1 = vcmask 261120   ;;  %s3666_s0 = smov 104  }
 0x1b8   : > { %3625 = vsyncadd (%p4592_p6), [#allocation24], 4294967264  ;;  %2732 = vmatprep.subr.bf16.mxu1 %v3664_v0  ;;  %2736 = vmatprep.mubr.msk.bf16.mxu1 %vm3665_vm0, %v3664_v0  ;;  %v4228_v3 = vld [vmem:[%s4181_s23] sm:$0xff]  ;;  %v2607_v5 = vld [vmem:[#allocation8] ss:$0 sm:$0xff]  ;;  %s3667_s17 = smov 120  }
 0x1b9   : > { %2746 = vmatprep.subr.bf16.mxu0 %v3664_v0  ;;  %2748 = vmatprep.mubr.msk.bf16.mxu0 %vm3665_vm0, %v3664_v0  ;;  %v694_v4 = vpack.c.bf16 %v4228_v3, %v4228_v3  ;;  %s3668_s18 = smov 112   ;;  %s3669_s4 = smov 96   ;;  %vm785_vm2 = vcmask 64512   ;;  %v4278_v26 = vld [vmem:[%s594_s27] ss:$0 sm:$0xff]  ;;  %vm1032_vm3 = vcmask 1043456  }
 0x1ba   : > { %2733 = vmatpush3.bf16.msra.mxu1 %v3086_v1  ;;  %s3670_s24 = smov 64   ;;  %s3671_s1 = smov 8   ;;  %vm1233_vm4 = vcmask 130048   ;;  %vm1235_vm5 = vcmask 195584   ;;  %vm1451_vm6 = vcmask 523264  }
 0x1bb   : > { %2734 = vmatprep.subr.bf16.mxu1 %v3664_v0  ;;  %s3672_s6 = smov 16   ;;  %s3673_s21 = smov 24  }
 0x1bc   : > { %s2669_s23 = sshll.u32 %s4578_s28, 7  ;;  %s690_s25 = scalar_lea.vmem [#allocation25], %s2593_s19 }
 0x1bd   : > { %s2370_s29 = sshll.u32 %s690_s25, 4  ;;  %p4594_p8 = scmp.ne.s32.totalorder %s4569_s14, 0  ;;  %s4464_s29 = int_to_ptr.vmem [resolvable:$true] %s2370_s29 }
 0x1be   : > { %2735 = vmatpush3.bf16.msra.mxu1 %v3087_v2  ;;  %s3674_s19 = smov [#allocation25]  }
 0x1bf   : > { %2740 = vmatprep.subr.bf16.mxu1 %v3664_v0  ;;  %s3550_s28 = sshll.u32 %s3674_s19, 4  ;;  %s3551_s28 = int_to_ptr.vmem [resolvable:$false] %s3550_s28 }
 0x1c0   : > { %p3553_p1 = scmp.lt.s32.totalorder %s4464_s29, %s3551_s28 }
 0x1c1   : > { %2737 = vmatmul.mubr.msk.bf16.vlgmr.msra.gmra.mrb[0].mxu1 %vm718_vm1, %v694_v4 }
 0x1c2   : > { %2742 = vmatprep.mubr.msk.bf16.mxu1 %vm3665_vm0, %v3664_v0 }
 0x294   : > { %v756_v6 = vpop.f32.mrb[0].mxu1 }
 0x295   : > { %v757_v7 = vadd.f32 %v2607_v5, %v756_v6  ;;  %v2738_v8 = vpop.f32.mrb[1].mxu1 }
 0x296   : > { %v759_v9 = vpop.f32.mrb[2].mxu1 }
 0x297   : > { %769 = vrot.lane.b32.xlu1 %v757_v7, %s3666_s0  ;;  %763 = vrot.lane.b32.xlu0 %v757_v7, %s3667_s17  ;;  %v2739_v10 = vpop.f32.mrb[3].mxu1  ;;  %v4239_v11 = vpack.c.bf16 %v757_v7, %v757_v7 }
 0x29b   : > { %766 = vrot.lane.b32.xlu0 %v757_v7, %s3668_s18  ;;  %783 = vrot.lane.b32.xlu1 %v4239_v11, %s3669_s4 }
 0x309   : > { %v770_v12 = vpop.permute.xlu1 %769  ;;  %v764_v13 = vpop.permute.xlu0 %763 }
 0x30a   : > { %v773_v14 = vpack.c.bf16 %v764_v13, %v764_v13  ;;  %v4245_v17 = vpack.c.bf16 %v770_v12, %v770_v12 }
 0x30c   : > { %833 = vrot.lane.b32.xlu0 %v773_v14, %s3669_s4 }
 0x30d   : > { %v767_v15 = vpop.permute.xlu0 %766  ;;  %v784_v16 = vpop.permute.xlu1 %783 }
 0x30e   : > { %v4247_v18 = vpack.c.bf16 %v767_v15, %v767_v15  ;;  %v790_v19 = vsel %vm785_vm2, %v784_v16, 0 }
 0x30f   : > { %2741 = vmatpush3.bf16.xpose.msra.mxu1 %v790_v19 }
 0x310   : > { %931 = vrot.lane.b32.xlu0 %v4245_v17, %s3669_s4  ;;  %882 = vrot.lane.b32.xlu1 %v4247_v18, %s3669_s4 }
 0x311   : > { %2752 = vmatprep.subr.bf16.mxu1 %v3664_v0 }
 0x316   : > { %2743 = vmatmul.mubr.msk.bf16.vlgmr.msra.gmra.mrb[4].mxu1 %vm785_vm2, %v4239_v11 }
 0x317   : > { %2754 = vmatprep.mubr.msk.bf16.mxu1 %vm3665_vm0, %v3664_v0 }
 0x37e   : > { %v834_v20 = vpop.permute.xlu0 %833 }
 0x37f   : > { %v839_v21 = vsel %vm785_vm2, %v834_v20, 0 }
 0x380   : > { %2747 = vmatpush3.bf16.xpose.msra.mxu0 %v839_v21 }
 0x381   : > { %2758 = vmatprep.subr.bf16.mxu0 %v3664_v0 }
 0x382   : > { %v883_v22 = vpop.permute.xlu1 %882  ;;  %v932_v24 = vpop.permute.xlu0 %931 }
 0x383   : > { %v888_v23 = vsel %vm785_vm2, %v883_v22, 0  ;;  %v937_v25 = vsel %vm785_vm2, %v932_v24, 0 }
 0x384   : > { %2753 = vmatpush3.bf16.xpose.msra.mxu1 %v888_v23 }
 0x385   : > { %2764 = vmatprep.subr.bf16.mxu1 %v3664_v0 }
 0x387   : > { %2749 = vmatmul.mubr.msk.bf16.vlgmr.msra.gmra.mrb[0].mxu0 %vm785_vm2, %v773_v14 }
 0x388   : > { %2759 = vmatpush3.bf16.xpose.msra.mxu0 %v937_v25  ;;  %2760 = vmatprep.mubr.msk.bf16.mxu0 %vm3665_vm0, %v3664_v0 }
 0x389   : > { %2770 = vmatprep.subr.bf16.mxu0 %v3664_v0 }
 0x38b   : > { %2755 = vmatmul.mubr.msk.bf16.vlgmr.msra.gmra.mrb[8].mxu1 %vm785_vm2, %v4247_v18 }
 0x38c   : > { %2766 = vmatprep.mubr.msk.bf16.mxu1 %vm3665_vm0, %v3664_v0 }
 0x38f   : > { %2761 = vmatmul.mubr.msk.bf16.vlgmr.msra.gmra.mrb[4].mxu0 %vm785_vm2, %v4245_v17 }
 0x390   : > { %2772 = vmatprep.mubr.msk.bf16.mxu0 %vm3665_vm0, %v3664_v0 }
 0x3e9   : > { %v826_v27 = vpop.f32.mrb[4].mxu1 }
 0x3ea   : > { %v827_v28 = vadd.f32 %v4278_v26, %v826_v27  ;;  %v2744_v29 = vpop.f32.mrb[5].mxu1 }
 0x3eb   : > { %v829_v30 = vpop.f32.mrb[6].mxu1 }
 0x3ec   : > { %v2745_v31 = vpop.f32.mrb[7].mxu1  ;;  %v979_v32 = vsel %vm785_vm2, %v827_v28, -inf }
 0x3ed   : > { %980 = vmax.xlane.f32.xlu1 %v979_v32 }
 0x45a   : > { %v875_v33 = vpop.f32.mrb[0].mxu0 }
 0x45b   : > { %v876_v34 = vadd.f32 %v4278_v26, %v875_v33  ;;  %v2750_v35 = vpop.f32.mrb[1].mxu0 }
 0x45c   : > { %v878_v36 = vpop.f32.mrb[2].mxu0 }
 0x45d   : > { %v2751_v37 = vpop.f32.mrb[3].mxu0  ;;  %v982_v38 = vsel %vm785_vm2, %v876_v34, -inf }
 0x45e   : > { %983 = vmax.xlane.f32.xlu0 %v982_v38  ;;  %v924_v39 = vpop.f32.mrb[8].mxu1  ;;  %v3088_v38 = vld [vmem:[#allocation10] sm:$0xff]  }
 0x45f   : > { %v925_v40 = vadd.f32 %v4278_v26, %v924_v39  ;;  %v2756_v41 = vpop.f32.mrb[9].mxu1  ;;  %v3089_v39 = vld [vmem:[#allocation10 + $0x8] sm:$0xff]  }
 0x460   : > { %v927_v42 = vpop.f32.mrb[10].mxu1 }
 0x461   : > { %v2757_v43 = vpop.f32.mrb[11].mxu1  ;;  %v985_v44 = vsel %vm785_vm2, %v925_v40, -inf }
 0x462   : > { %v973_v45 = vpop.f32.mrb[4].mxu0  ;;  %986 = vmax.xlane.f32.xlu0 %v985_v44 }
 0x463   : > { %v974_v46 = vadd.f32 %v4278_v26, %v973_v45  ;;  %v2762_v47 = vpop.f32.mrb[5].mxu0 }
 0x464   : > { %v976_v48 = vpop.f32.mrb[6].mxu0 }
 0x465   : > { %v2763_v49 = vpop.f32.mrb[7].mxu0  ;;  %v988_v50 = vsel %vm785_vm2, %v974_v46, -inf }
 0x466   : > { %989 = vmax.xlane.f32.xlu1 %v988_v50 }
 0x477   : > { %1076 = vrot.lane.b32.xlu1 %v773_v14, %s3670_s24 }
 0x478   : > { %1027 = vrot.lane.b32.xlu0 %v4239_v11, %s3670_s24 }
 0x47a   : > { %v981_v51 = vpop.xlane.xlu1 %980 }
 0x47b   : > { %v991_v52 = vsub.f32 %v827_v28, %v981_v51 }
 0x47d   : > { %v995_v53 = vmul.f32 1.442695, %v991_v52 }
 0x47f   : > { %3106 = vpow2.f32 %v995_v53 }
 0x489   : > { %v3107_v54 = vpop.eup %3106 }
 0x48a   : > { %v1003_v55 = vsel %vm785_vm2, %v3107_v54, 0.0 }
 0x497   : > { %1004 = vadd.xlane.f32.xlu0 %v1003_v55 }
 0x4eb   : > { %v984_v56 = vpop.xlane.xlu0 %983 }
 0x4ec   : > { %v992_v57 = vsub.f32 %v876_v34, %v984_v56 }
 0x4ee   : > { %v997_v58 = vmul.f32 1.442695, %v992_v57 }
 0x4ef   : > { %v987_v59 = vpop.xlane.xlu0 %986 }
 0x4f0   : > { %3108 = vpow2.f32 %v997_v58  ;;  %v993_v60 = vsub.f32 %v925_v40, %v987_v59  ;;  %v2620_v59 = vld [vmem:[#allocation11] ss:$0 sm:$0xff] }
 0x4f2   : > { %v999_v61 = vmul.f32 1.442695, %v993_v60 }
 0x4f3   : > { %v990_v62 = vpop.xlane.xlu1 %989  ;;  %v1028_v63 = vpop.permute.xlu0 %1027 }
 0x4f4   : > { %3110 = vpow2.f32 %v999_v61  ;;  %v994_v1 = vsub.f32 %v974_v46, %v990_v62  ;;  %v1034_v2 = vsel %vm1032_vm3, %v1028_v63, 0 }
 0x4f5   : > { %2765 = vmatpush3.bf16.msra.mxu1 %v1034_v2 }
 0x4f6   : > { %v1001_v4 = vmul.f32 1.442695, %v994_v1  ;;  %2776 = vmatprep.subr.bf16.mxu1 %v3664_v0 }
 0x4f7   : > { %v1077_v5 = vpop.permute.xlu1 %1076 }
 0x4f8   : > { %3112 = vpow2.f32 %v1001_v4  ;;  %v1082_v6 = vsel %vm1032_vm3, %v1077_v5, 0 }
 0x4f9   : > { %2771 = vmatpush3.bf16.msra.mxu0 %v1082_v6 }
 0x4fa   : > { %v3109_v7 = vpop.eup %3108  ;;  %2782 = vmatprep.subr.bf16.mxu0 %v3664_v0 }
 0x4fb   : > { %v1006_v8 = vsel %vm785_vm2, %v3109_v7, 0.0 }
 0x4fc   : > { %1007 = vadd.xlane.f32.xlu1 %v1006_v8 }
 0x4fe   : > { %v3111_v9 = vpop.eup %3110 }
 0x4ff   : > { %v1009_v10 = vsel %vm785_vm2, %v3111_v9, 0.0 }
 0x500   : > { %1010 = vadd.xlane.f32.xlu0 %v1009_v10  ;;  %v3090_v10 = vld [vmem:[#allocation16] sm:$0xff]  }
 0x502   : > { %v3113_v11 = vpop.eup %3112 }
 0x503   : > { %v1012_v12 = vsel %vm785_vm2, %v3113_v11, 0.0 }
 0x504   : > { %1013 = vadd.xlane.f32.xlu1 %v1012_v12 }
 0x515   : > { %1124 = vrot.lane.b32.xlu1 %v4247_v18, %s3670_s24 }
 0x516   : > { %1172 = vrot.lane.b32.xlu0 %v4245_v17, %s3670_s24 }
 0x524   : > { %v1005_v13 = vpop.xlane.xlu0 %1004 }
 0x525   : > { %3114 = vrcp.f32 %v1005_v13 }
 0x52f   : > { %v3115_v14 = vpop.eup %3114 }
 0x530   : > { %v1019_v15 = vmul.f32 %v3115_v14, %v3107_v54 }
 0x532   : > { %v1023_v16 = vpack.c.bf16 %v1019_v15, %v1019_v15  ;;  %v2624_v15 = vld [vmem:[#allocation13] ss:$0 sm:$0xff] }
 0x534   : > { %2767 = vmatmul.mubr.msk.bf16.vlgmr.msra.gmra.mrb[12].mxu1 %vm785_vm2, %v1023_v16 }
 0x535   : > { %2778 = vmatprep.mubr.msk.bf16.mxu1 %vm3665_vm0, %v3664_v0 }
 0x589   : > { %v1008_v19 = vpop.xlane.xlu1 %1007 }
 0x58a   : > { %3116 = vrcp.f32 %v1008_v19  ;;  %v2625_v19 = vld [vmem:[#allocation14] ss:$0 sm:$0xff] }
 0x58d   : > { %v1011_v20 = vpop.xlane.xlu0 %1010 }
 0x58e   : > { %3118 = vrcp.f32 %v1011_v20 }
 0x591   : > { %v1014_v21 = vpop.xlane.xlu1 %1013  ;;  %v1173_v17 = vpop.permute.xlu0 %1172 }
 0x592   : > { %3120 = vrcp.f32 %v1014_v21  ;;  %v1178_v29 = vsel %vm1032_vm3, %v1173_v17, 0  ;;  %v3094_v17 = vld [vmem:[#allocation19 + $0x10] sm:$0xff]  }
 0x594   : > { %v3117_v18 = vpop.eup %3116 }
 0x595   : > { %v1020_v22 = vmul.f32 %v3117_v18, %v3109_v7  ;;  %v1125_v23 = vpop.permute.xlu1 %1124 }
 0x596   : > { %v1130_v24 = vsel %vm1032_vm3, %v1125_v23, 0  ;;  %v3093_v23 = vld [vmem:[#allocation19 + $0x8] sm:$0xff]  }
 0x597   : > { %2777 = vmatpush3.bf16.msra.mxu1 %v1130_v24  ;;  %v1024_v25 = vpack.c.bf16 %v1020_v22, %v1020_v22  ;;  %v3092_v22 = vld [vmem:[#allocation19] sm:$0xff]   ;;  %v3095_v24 = vld [vmem:[#allocation19 + $0x18] sm:$0xff]  }
 0x598   : > { %v3119_v27 = vpop.eup %3118  ;;  %2788 = vmatprep.subr.bf16.mxu1 %v3664_v0 }
 0x599   : > { %v1021_v28 = vmul.f32 %v3119_v27, %v3111_v9  ;;  %2773 = vmatmul.mubr.msk.bf16.vlgmr.msra.gmra.mrb[8].mxu0 %vm785_vm2, %v1024_v25  ;;  %v2626_v25 = vld [vmem:[#allocation17] ss:$0 sm:$0xff] }
 0x59a   : > { %2783 = vmatpush3.bf16.msra.mxu0 %v1178_v29  ;;  %2784 = vmatprep.mubr.msk.bf16.mxu0 %vm3665_vm0, %v3664_v0 }
 0x59b   : > { %v1025_v30 = vpack.c.bf16 %v1021_v28, %v1021_v28  ;;  %2796 = vmatprep.subr.bf16.mxu0 %v3664_v0 }
 0x59c   : > { %v3121_v31 = vpop.eup %3120 }
 0x59d   : > { %v1022_v32 = vmul.f32 %v3121_v31, %v3113_v11  ;;  %2779 = vmatmul.mubr.msk.bf16.vlgmr.msra.gmra.mrb[16].mxu1 %vm785_vm2, %v1025_v30  ;;  %v3091_v11 = vld [vmem:[#allocation16 + $0x8] sm:$0xff]  }
 0x59e   : > { %2792 = vmatprep.mubr.msk.bf16.mxu1 %vm3665_vm0, %v3664_v0  ;;  %2789 = vmatpush3.bf16.msra.mxu1 %v3088_v38 }
 0x59f   : > { %v1026_v33 = vpack.c.bf16 %v1022_v32, %v1022_v32  ;;  %2790 = vmatprep.subr.bf16.mxu1 %v3664_v0 }
 0x5a1   : > { %2785 = vmatmul.mubr.msk.bf16.vlgmr.msra.gmra.mrb[12].mxu0 %vm785_vm2, %v1026_v33 }
 0x5a2   : > { %2800 = vmatprep.mubr.msk.bf16.mxu0 %vm3665_vm0, %v3664_v0  ;;  %2791 = vmatpush3.bf16.msra.mxu1 %v3089_v39 }
 0x5a3   : > { %2804 = vmatprep.subr.bf16.mxu1 %v3664_v0  ;;  %2797 = vmatpush3.bf16.msra.mxu0 %v3090_v10 }
 0x5a4   : > { %2798 = vmatprep.subr.bf16.mxu0 %v3664_v0 }
 0x5a7   : > { %2799 = vmatpush3.bf16.msra.mxu0 %v3091_v11 }
 0x5a8   : > { %2816 = vmatprep.subr.bf16.mxu0 %v3664_v0 }
 0x607   : > { %v1070_v34 = vpop.f32.mrb[12].mxu1 }
 0x608   : > { %v2768_v35 = vpop.f32.mrb[13].mxu1 }
 0x609   : > { %v1073_v36 = vpop.f32.mrb[14].mxu1 }
 0x60a   : > { %v2769_v37 = vpop.f32.mrb[15].mxu1 }
 0x66c   : > { %v1118_v40 = vpop.f32.mrb[8].mxu0 }
 0x66d   : > { %1221 = vrot.lane.b32.xlu1 %v1118_v40, %s3671_s1  ;;  %v2774_v41 = vpop.f32.mrb[9].mxu0 }
 0x66e   : > { %v1121_v42 = vpop.f32.mrb[10].mxu0 }
 0x66f   : > { %v2775_v43 = vpop.f32.mrb[11].mxu0  ;;  %v2630_v42 = vld [vmem:[#allocation20] ss:$0 sm:$0xff] }
 0x670   : > { %v1166_v44 = vpop.f32.mrb[16].mxu1 }
 0x671   : > { %1225 = vrot.lane.b32.xlu0 %v1166_v44, %s3672_s6  ;;  %v2780_v45 = vpop.f32.mrb[17].mxu1 }
 0x672   : > { %v1169_v46 = vpop.f32.mrb[18].mxu1 }
 0x673   : > { %v2781_v47 = vpop.f32.mrb[19].mxu1 }
 0x674   : > { %v1214_v48 = vpop.f32.mrb[12].mxu0 }
 0x675   : > { %1229 = vrot.lane.b32.xlu1 %v1214_v48, %s3673_s21  ;;  %v2786_v49 = vpop.f32.mrb[13].mxu0 }
 0x676   : > { %v1217_v50 = vpop.f32.mrb[14].mxu0 }
 0x677   : > { %v2787_v51 = vpop.f32.mrb[15].mxu0 }
 0x6df   : > { %v1222_v52 = vpop.permute.xlu1 %1221 }
 0x6e0   : > { %v1232_v54 = vsel %vm785_vm2, %v1070_v34, %v1222_v52 }
 0x6e3   : > { %v1226_v53 = vpop.permute.xlu0 %1225 }
 0x6e4   : > { %v1234_v55 = vsel %vm1233_vm4, %v1232_v54, %v1226_v53 }
 0x6e7   : > { %v1230_v56 = vpop.permute.xlu1 %1229 }
 0x6e8   : > { %v1236_v57 = vsel %vm1235_vm5, %v1234_v55, %v1230_v56  ;;  %v3096_v55 = vld [vmem:[#allocation7 + $0x10] sm:$0xff]   ;;  %v3097_v56 = vld [vmem:[#allocation7 + $0x18] sm:$0xff]  }
 0x6e9   : > { %v1237_v58 = vpack.c.bf16 %v1236_v57, %v1236_v57 }
 0x6eb   : > { %2793 = vmatmul.mubr.msk.bf16.vlgmr.msra.gmra.mrb[20].mxu1 %vm718_vm1, %v1237_v58 }
 0x6ec   : > { %2812 = vmatprep.mubr.msk.bf16.mxu1 %vm3665_vm0, %v3664_v0  ;;  %2805 = vmatpush3.bf16.msra.mxu1 %v3092_v22 }
 0x6ed   : > { %2806 = vmatprep.subr.bf16.mxu1 %v3664_v0 }
 0x6f0   : > { %2807 = vmatpush3.bf16.msra.mxu1 %v3093_v23 }
 0x6f1   : > { %2808 = vmatprep.subr.bf16.mxu1 %v3664_v0 }
 0x6f4   : > { %2809 = vmatpush3.bf16.msra.mxu1 %v3094_v17 }
 0x6f5   : > { %2810 = vmatprep.subr.bf16.mxu1 %v3664_v0 }
 0x6f8   : > { %2811 = vmatpush3.bf16.msra.mxu1 %v3095_v24 }
 0x6f9   : > { %2830 = vmatprep.subr.bf16.mxu1 %v3664_v0 }
 0x7be   : > { %v1298_v60 = vpop.f32.mrb[20].mxu1 }
 0x7bf   : > { %v1299_v61 = vadd.f32 %v2620_v59, %v1298_v60  ;;  %v2794_v62 = vpop.f32.mrb[21].mxu1 }
 0x7c0   : > { %v1301_v63 = vpop.f32.mrb[22].mxu1 }
 0x7c1   : > { %v2795_v1 = vpop.f32.mrb[23].mxu1  ;;  %v1304_v2 = vadd.f32 %v1299_v61, %v4228_v3  ;;  %v2636_v61 = vld [vmem:[#allocation22] ss:$0 sm:$0xff]  ;;  %v2637_v63 = vld [vmem:[#allocation23] ss:$0 sm:$0xff] }
 0x7c3   : > { %v1307_v4 = vsel %vm718_vm1, %v1304_v2, 0.0 }
 0x7c4   : > { %1308 = vadd.xlane.f32.xlu0 %v1307_v4 }
 0x851   : > { %v1309_v5 = vpop.xlane.xlu0 %1308 }
 0x852   : > { %v1311_v6 = vmul.f32 0.03125, %v1309_v5  ;;  %v2638_v5 = vld [vmem:[#allocation8 + $0x1] ss:$0 sm:$0xff] }
 0x854   : > { %v1312_v7 = vsub.f32 %v1304_v2, %v1311_v6 }
 0x856   : > { %v1313_v8 = vmul.f32 %v1312_v7, %v1312_v7 }
 0x858   : > { %v1314_v9 = vsel %vm718_vm1, %v1313_v8, 0.0 }
 0x859   : > { %1315 = vadd.xlane.f32.xlu1 %v1314_v9 }
 0x8e6   : > { %v1316_v12 = vpop.xlane.xlu1 %1315 }
 0x8e7   : > { %v1317_v3 = vmul.f32 0.03125, %v1316_v12 }
 0x8e9   : > { %v1318_v13 = vadd.f32 1e-12, %v1317_v3 }
 0x8eb   : > { %3122 = vrsqrt.f32 %v1318_v13 }
 0x8f5   : > { %v3123_v14 = vpop.eup %3122 }
 0x8f6   : > { %v1320_v16 = vmul.f32 %v3123_v14, %v1312_v7 }
 0x8f8   : > { %v1327_v20 = vmul.f32 %v2624_v15, %v1320_v16 }
 0x8fa   : > { %v1334_v21 = vadd.f32 %v2625_v19, %v1327_v20 }
 0x8fc   : > { %v1335_v18 = vpack.c.bf16 %v1334_v21, %v1334_v21 }
 0x8fe   : > { %2801 = vmatmul.mubr.msk.bf16.vlgmr.msra.gmra.mrb[16].mxu0 %vm718_vm1, %v1335_v18 }
 0x8ff   : > { %2820 = vmatprep.mubr.msk.bf16.mxu0 %vm3665_vm0, %v3664_v0  ;;  %2817 = vmatpush3.bf16.msra.mxu0 %v3096_v55 }
 0x900   : > { %2818 = vmatprep.subr.bf16.mxu0 %v3664_v0 }
 0x903   : > { %2819 = vmatpush3.bf16.msra.mxu0 %v3097_v56 }
 0x904   : > { %2824 = vmatprep.subr.bf16.mxu0 %v3664_v0 }
 0x9d1   : > { %v1396_v27 = vpop.f32.mrb[16].mxu0 }
 0x9d2   : > { %v1397_v28 = vadd.f32 %v2626_v25, %v1396_v27  ;;  %v2802_v29 = vpop.f32.mrb[17].mxu0 }
 0x9d3   : > { %v1399_v30 = vpop.f32.mrb[18].mxu0 }
 0x9d4   : > { %v1402_v31 = vmul.f32 %v1397_v28, %v1397_v28  ;;  %v2803_v32 = vpop.f32.mrb[19].mxu0 }
 0x9d6   : > { %v1403_v33 = vmul.f32 %v1402_v31, %v1397_v28 }
 0x9d8   : > { %v1404_v34 = vmul.f32 0.044715, %v1403_v33 }
 0x9da   : > { %v1405_v35 = vadd.f32 %v1404_v34, %v1397_v28 }
 0x9dc   : > { %v1406_v36 = vmul.f32 0.7978846, %v1405_v35 }
 0x9de   : > { %3124 = vtanh.f32 %v1406_v36 }
 0x9e8   : > { %v3125_v37 = vpop.eup %3124 }
 0x9e9   : > { %v1408_v38 = vadd.f32 1.0, %v3125_v37 }
 0x9eb   : > { %v1409_v39 = vmul.f32 0.5, %v1408_v38 }
 0x9ed   : > { %v1410_v40 = vmul.f32 %v1409_v39, %v1397_v28 }
 0x9ef   : > { %v1411_v41 = vpack.c.bf16 %v1410_v40, %v1410_v40 }
 0x9f1   : > { %2813 = vmatmul.mubr.msk.bf16.vlgmr.msra.gmra.mrb[24].mxu1 %vm1451_vm6, %v1411_v41 }
 0x9f2   : > { %2832 = vmatprep.mubr.msk.bf16.mxu1 %vm3665_vm0, %v3664_v0 }
 0xac4   : > { %v1489_v43 = vpop.f32.mrb[24].mxu1 }
 0xac5   : > { %v1490_v44 = vadd.f32 %v2630_v42, %v1489_v43  ;;  %v2814_v45 = vpop.f32.mrb[25].mxu1 }
 0xac6   : > { %v1492_v46 = vpop.f32.mrb[26].mxu1 }
 0xac7   : > { %v2815_v47 = vpop.f32.mrb[27].mxu1  ;;  %v1495_v48 = vadd.f32 %v1490_v44, %v1334_v21 }
 0xac9   : > { %v1498_v49 = vsel %vm718_vm1, %v1495_v48, 0.0 }
 0xaca   : > { %1499 = vadd.xlane.f32.xlu0 %v1498_v49 }
 0xb57   : > { %v1500_v50 = vpop.xlane.xlu0 %1499 }
 0xb58   : > { %v1501_v51 = vmul.f32 0.03125, %v1500_v50 }
 0xb5a   : > { %v1502_v52 = vsub.f32 %v1495_v48, %v1501_v51 }
 0xb5c   : > { %v1503_v53 = vmul.f32 %v1502_v52, %v1502_v52 }
 0xb5e   : > { %v1504_v54 = vsel %vm718_vm1, %v1503_v53, 0.0 }
 0xb5f   : > { %1505 = vadd.xlane.f32.xlu0 %v1504_v54 }
 0xbec   : > { %v1506_v57 = vpop.xlane.xlu0 %1505 }
 0xbed   : > { %v1507_v58 = vmul.f32 0.03125, %v1506_v57 }
 0xbef   : > { %v1508_v59 = vadd.f32 1e-12, %v1507_v58 }
 0xbf1   : > { %3126 = vrsqrt.f32 %v1508_v59 }
 0xbfb   : > { %v3127_v60 = vpop.eup %3126 }
 0xbfc   : > { %v1510_v62 = vmul.f32 %v3127_v60, %v1502_v52 }
 0xbfe   : > { %v1517_v1 = vmul.f32 %v2636_v61, %v1510_v62 }
 0xc00   : > { %v4349_v2 = vadd.f32 %v2637_v63, %v1517_v1 }
 0xc02   : > { %v1525_v4 = vpack.c.bf16 %v4349_v2, %v4349_v2 }
 0xc04   : > { %2821 = vmatmul.mubr.msk.bf16.vlgmr.msra.gmra.mrb[20].mxu0 %vm718_vm1, %v1525_v4 }
 0xc05   : > { %2826 = vmatprep.mubr.msk.bf16.mxu0 %vm3665_vm0, %v3664_v0 }
 0xcd7   : > { %v1588_v6 = vpop.f32.mrb[20].mxu0 }
 0xcd8   : > { %v1589_v7 = vadd.f32 %v2638_v5, %v1588_v6  ;;  %v2822_v8 = vpop.f32.mrb[21].mxu0 }
 0xcd9   : > { %v1591_v9 = vpop.f32.mrb[22].mxu0 }
 0xcda   : > { %1598 = vrot.lane.b32.xlu0 %v1589_v7, %s3668_s18  ;;  %1595 = vrot.lane.b32.xlu1 %v1589_v7, %s3667_s17  ;;  %v2823_v10 = vpop.f32.mrb[23].mxu0  ;;  %v4359_v11 = vpack.c.bf16 %v1589_v7, %v1589_v7  ;;  %s4593_s17 = sld [smem:[#allocation46_spill]] }
 0xcde   : > { %1601 = vrot.lane.b32.xlu1 %v1589_v7, %s3666_s0 }
 0xce0   : > { %s4462_s18 = scalar_lea.hbm %s4593_s17, %s2669_s23 }
 0xce2   : > { %1609 = vrot.lane.b32.xlu1 %v4359_v11, %s3669_s4 }
 0xd4c   : > { %v1599_v12 = vpop.permute.xlu0 %1598  ;;  %v1596_v3 = vpop.permute.xlu1 %1595 }
 0xd4d   : > { %v4363_v13 = vpack.c.bf16 %v1599_v12, %v1599_v12  ;;  %v1605_v14 = vpack.c.bf16 %v1596_v3, %v1596_v3 }
 0xd4f   : > { %1658 = vrot.lane.b32.xlu0 %v1605_v14, %s3669_s4  ;;  %1707 = vrot.lane.b32.xlu1 %v4363_v13, %s3669_s4 }
 0xd50   : > { %v1602_v15 = vpop.permute.xlu1 %1601 }
 0xd51   : > { %v4368_v16 = vpack.c.bf16 %v1602_v15, %v1602_v15 }
 0xd53   : > { %1756 = vrot.lane.b32.xlu0 %v4368_v16, %s3669_s4  ;;  %s2357_s4 = scalar_lea.sflag [#allocation4], %s4175_s2 }
 0xd54   : > { %v1610_v19 = vpop.permute.xlu1 %1609 }
 0xd55   : > { %v1615_v20 = vsel %vm785_vm2, %v1610_v19, 0 }
 0xd56   : > { %2825 = vmatpush3.bf16.xpose.msra.mxu0 %v1615_v20 }
 0xd57   : > { %2836 = vmatprep.subr.bf16.mxu0 %v3664_v0 }
 0xd5d   : > { %2827 = vmatmul.mubr.msk.bf16.vlgmr.msra.gmra.mrb[24].mxu0 %vm785_vm2, %v4359_v11 }
 0xd5e   : > { %2838 = vmatprep.mubr.msk.bf16.mxu0 %vm3665_vm0, %v3664_v0 }
 0xdc1   : > { %v1659_v21 = vpop.permute.xlu0 %1658  ;;  %v1708_v18 = vpop.permute.xlu1 %1707 }
 0xdc2   : > { %v1664_v22 = vsel %vm785_vm2, %v1659_v21, 0  ;;  %v1713_v23 = vsel %vm785_vm2, %v1708_v18, 0 }
 0xdc3   : > { %2831 = vmatpush3.bf16.xpose.msra.mxu1 %v1664_v22  ;;  %2837 = vmatpush3.bf16.xpose.msra.mxu0 %v1713_v23 }
 0xdc4   : > { %2842 = vmatprep.subr.bf16.mxu1 %v3664_v0  ;;  %2848 = vmatprep.subr.bf16.mxu0 %v3664_v0 }
 0xdc5   : > { %v1757_v17 = vpop.permute.xlu0 %1756 }
 0xdc6   : > { %v1762_v24 = vsel %vm785_vm2, %v1757_v17, 0 }
 0xdca   : > { %2833 = vmatmul.mubr.msk.bf16.vlgmr.msra.gmra.mrb[28].mxu1 %vm785_vm2, %v1605_v14  ;;  %2839 = vmatmul.mubr.msk.bf16.vlgmr.msra.gmra.mrb[28].mxu0 %vm785_vm2, %v4363_v13 }
 0xdcb   : > { %2843 = vmatpush3.bf16.xpose.msra.mxu1 %v1762_v24  ;;  %2844 = vmatprep.mubr.msk.bf16.mxu1 %vm3665_vm0, %v3664_v0 }
 0xdcc   : > { %2854 = vmatprep.subr.bf16.mxu1 %v3664_v0  ;;  %2850 = vmatprep.mubr.msk.bf16.mxu0 %vm3665_vm0, %v3664_v0 }
 0xdd2   : > { %2845 = vmatmul.mubr.msk.bf16.vlgmr.msra.gmra.mrb[32].mxu1 %vm785_vm2, %v4368_v16 }
 0xdd3   : > { %2856 = vmatprep.mubr.msk.bf16.mxu1 %vm3665_vm0, %v3664_v0 }
 0xe30   : > { %v1651_v25 = vpop.f32.mrb[24].mxu0 }
 0xe31   : > { %v1652_v27 = vadd.f32 %v4278_v26, %v1651_v25  ;;  %v2828_v28 = vpop.f32.mrb[25].mxu0 }
 0xe32   : > { %v1654_v29 = vpop.f32.mrb[26].mxu0 }
 0xe33   : > { %v2829_v30 = vpop.f32.mrb[27].mxu0  ;;  %v1804_v31 = vsel %vm785_vm2, %v1652_v27, -inf }
 0xe34   : > { %1805 = vmax.xlane.f32.xlu1 %v1804_v31 }
 0xe9d   : > { %v1700_v32 = vpop.f32.mrb[28].mxu1  ;;  %v1749_v33 = vpop.f32.mrb[28].mxu0 }
 0xe9e   : > { %v1701_v34 = vadd.f32 %v4278_v26, %v1700_v32  ;;  %v2834_v35 = vpop.f32.mrb[29].mxu1  ;;  %v2840_v36 = vpop.f32.mrb[29].mxu0  ;;  %v1750_v39 = vadd.f32 %v4278_v26, %v1749_v33 }
 0xe9f   : > { %v1703_v37 = vpop.f32.mrb[30].mxu1  ;;  %v1752_v38 = vpop.f32.mrb[30].mxu0  ;;  %v3098_v36 = vld [vmem:[#allocation10 + $0x10] sm:$0xff]  }
 0xea0   : > { %v2835_v40 = vpop.f32.mrb[31].mxu1  ;;  %v2841_v41 = vpop.f32.mrb[31].mxu0  ;;  %v1807_v42 = vsel %vm785_vm2, %v1701_v34, -inf  ;;  %v1810_v43 = vsel %vm785_vm2, %v1750_v39, -inf  ;;  %v3099_v37 = vld [vmem:[#allocation10 + $0x18] sm:$0xff]  }
 0xea1   : > { %1808 = vmax.xlane.f32.xlu0 %v1807_v42 }
 0xea5   : > { %1811 = vmax.xlane.f32.xlu0 %v1810_v43  ;;  %v1798_v44 = vpop.f32.mrb[32].mxu1 }
 0xea6   : > { %v1799_v45 = vadd.f32 %v4278_v26, %v1798_v44  ;;  %v2846_v46 = vpop.f32.mrb[33].mxu1 }
 0xea7   : > { %v1801_v47 = vpop.f32.mrb[34].mxu1 }
 0xea8   : > { %v2847_v48 = vpop.f32.mrb[35].mxu1  ;;  %v1813_v49 = vsel %vm785_vm2, %v1799_v45, -inf }
 0xea9   : > { %1814 = vmax.xlane.f32.xlu1 %v1813_v49 }
 0xeba   : > { %1900 = vrot.lane.b32.xlu1 %v1605_v14, %s3670_s24 }
 0xebb   : > { %1852 = vrot.lane.b32.xlu0 %v4359_v11, %s3670_s24 }
 0xec1   : > { %v1806_v50 = vpop.xlane.xlu1 %1805 }
 0xec2   : > { %v1816_v51 = vsub.f32 %v1652_v27, %v1806_v50 }
 0xec4   : > { %v1820_v52 = vmul.f32 1.442695, %v1816_v51 }
 0xec6   : > { %3128 = vpow2.f32 %v1820_v52 }
 0xed0   : > { %v3129_v53 = vpop.eup %3128 }
 0xed1   : > { %v1828_v54 = vsel %vm785_vm2, %v3129_v53, 0.0 }
 0xeda   : > { %1829 = vadd.xlane.f32.xlu0 %v1828_v54 }
 0xf2e   : > { %v1809_v26 = vpop.xlane.xlu0 %1808 }
 0xf2f   : > { %v1817_v55 = vsub.f32 %v1701_v34, %v1809_v26 }
 0xf31   : > { %v1822_v56 = vmul.f32 1.442695, %v1817_v55 }
 0xf32   : > { %v1812_v57 = vpop.xlane.xlu0 %1811 }
 0xf33   : > { %3130 = vpow2.f32 %v1822_v56  ;;  %v1818_v58 = vsub.f32 %v1750_v39, %v1812_v57  ;;  %v2650_v56 = vld [vmem:[#allocation11 + $0x1] ss:$0 sm:$0xff] }
 0xf35   : > { %v1824_v59 = vmul.f32 1.442695, %v1818_v58 }
 0xf36   : > { %v1853_v60 = vpop.permute.xlu0 %1852  ;;  %v1815_v61 = vpop.xlane.xlu1 %1814 }
 0xf37   : > { %3132 = vpow2.f32 %v1824_v59  ;;  %v1858_v62 = vsel %vm1032_vm3, %v1853_v60, 0  ;;  %v1819_v63 = vsub.f32 %v1799_v45, %v1815_v61 }
 0xf38   : > { %2849 = vmatpush3.bf16.msra.mxu0 %v1858_v62 }
 0xf39   : > { %v1826_v1 = vmul.f32 1.442695, %v1819_v63  ;;  %2860 = vmatprep.subr.bf16.mxu0 %v3664_v0 }
 0xf3a   : > { %v1901_v4 = vpop.permute.xlu1 %1900 }
 0xf3b   : > { %3134 = vpow2.f32 %v1826_v1  ;;  %v1906_v5 = vsel %vm1032_vm3, %v1901_v4, 0 }
 0xf3c   : > { %2855 = vmatpush3.bf16.msra.mxu1 %v1906_v5 }
 0xf3d   : > { %v3131_v6 = vpop.eup %3130  ;;  %2866 = vmatprep.subr.bf16.mxu1 %v3664_v0 }
 0xf3e   : > { %v1831_v7 = vsel %vm785_vm2, %v3131_v6, 0.0 }
 0xf3f   : > { %1832 = vadd.xlane.f32.xlu1 %v1831_v7 }
 0xf41   : > { %v3133_v8 = vpop.eup %3132 }
 0xf42   : > { %v1834_v9 = vsel %vm785_vm2, %v3133_v8, 0.0 }
 0xf43   : > { %1835 = vadd.xlane.f32.xlu0 %v1834_v9  ;;  %v3101_v9 = vld [vmem:[#allocation16 + $0x18] sm:$0xff]  }
 0xf45   : > { %v3135_v10 = vpop.eup %3134 }
 0xf46   : > { %v1837_v11 = vsel %vm785_vm2, %v3135_v10, 0.0 }
 0xf47   : > { %1838 = vadd.xlane.f32.xlu1 %v1837_v11 }
 0xf58   : > { %1948 = vrot.lane.b32.xlu1 %v4363_v13, %s3670_s24 }
 0xf59   : > { %1996 = vrot.lane.b32.xlu0 %v4368_v16, %s3670_s24  ;;  %s3546_s24 = scalar_lea.vmem %s4464_s29, 128 }
 0xf5a   : > { %p3547_p4 = scmp.ne.s32.totalorder %s4464_s29, %s3546_s24 }
 0xf5c   : > { %p3548_p5 = pnand %p3547_p4, %p4594_p8 }
 0xf5e   : > { %p3549_p10 = pneg %p3548_p5 }
 0xf67   : > { %v1830_v12 = vpop.xlane.xlu0 %1829 }
 0xf68   : > { %3136 = vrcp.f32 %v1830_v12 }
 0xf72   : > { %v3137_v3 = vpop.eup %3136 }
 0xf73   : > { %v1844_v14 = vmul.f32 %v3137_v3, %v3129_v53  ;;  %v2654_v3 = vld [vmem:[#allocation13 + $0x1] ss:$0 sm:$0xff] }
 0xf75   : > { %v1848_v15 = vpack.c.bf16 %v1844_v14, %v1844_v14 }
 0xf77   : > { %2851 = vmatmul.mubr.msk.bf16.vlgmr.msra.gmra.mrb[32].mxu0 %vm785_vm2, %v1848_v15  ;;  %v2655_v15 = vld [vmem:[#allocation14 + $0x1] ss:$0 sm:$0xff] }
 0xf78   : > { %2862 = vmatprep.mubr.msk.bf16.mxu0 %vm3665_vm0, %v3664_v0 }
 0xfcc   : > { %v1833_v19 = vpop.xlane.xlu1 %1832 }
 0xfcd   : > { %3138 = vrcp.f32 %v1833_v19 }
 0xfd0   : > { %v1836_v20 = vpop.xlane.xlu0 %1835 }
 0xfd1   : > { %3140 = vrcp.f32 %v1836_v20 }
 0xfd4   : > { %v1839_v21 = vpop.xlane.xlu1 %1838  ;;  %v1997_v16 = vpop.permute.xlu0 %1996 }
 0xfd5   : > { %3142 = vrcp.f32 %v1839_v21  ;;  %v2002_v27 = vsel %vm1032_vm3, %v1997_v16, 0  ;;  %v3105_v16 = vld [vmem:[#allocation19 + $0x38] sm:$0xff]  }
 0xfd7   : > { %v3139_v13 = vpop.eup %3138 }
 0xfd8   : > { %v1845_v18 = vmul.f32 %v3139_v13, %v3131_v6  ;;  %v1949_v22 = vpop.permute.xlu1 %1948  ;;  %v3102_v13 = vld [vmem:[#allocation19 + $0x20] sm:$0xff]  }
 0xfd9   : > { %v1954_v23 = vsel %vm1032_vm3, %v1949_v22, 0  ;;  %v3104_v22 = vld [vmem:[#allocation19 + $0x30] sm:$0xff]  }
 0xfda   : > { %2861 = vmatpush3.bf16.msra.mxu0 %v1954_v23  ;;  %v1849_v17 = vpack.c.bf16 %v1845_v18, %v1845_v18  ;;  %v3103_v18 = vld [vmem:[#allocation19 + $0x28] sm:$0xff]   ;;  %v2656_v23 = vld [vmem:[#allocation17 + $0x1] ss:$0 sm:$0xff] }
 0xfdb   : > { %v3141_v24 = vpop.eup %3140  ;;  %2872 = vmatprep.subr.bf16.mxu0 %v3664_v0 }
 0xfdc   : > { %v1846_v25 = vmul.f32 %v3141_v24, %v3133_v8  ;;  %2857 = vmatmul.mubr.msk.bf16.vlgmr.msra.gmra.mrb[36].mxu1 %vm785_vm2, %v1849_v17  ;;  %v3100_v8 = vld [vmem:[#allocation16 + $0x10] sm:$0xff]  }
 0xfdd   : > { %2867 = vmatpush3.bf16.msra.mxu1 %v2002_v27  ;;  %2868 = vmatprep.mubr.msk.bf16.mxu1 %vm3665_vm0, %v3664_v0 }
 0xfde   : > { %v1850_v28 = vpack.c.bf16 %v1846_v25, %v1846_v25  ;;  %2880 = vmatprep.subr.bf16.mxu1 %v3664_v0 }
 0xfdf   : > { %v3143_v29 = vpop.eup %3142 }
 0xfe0   : > { %v1847_v30 = vmul.f32 %v3143_v29, %v3135_v10  ;;  %2863 = vmatmul.mubr.msk.bf16.vlgmr.msra.gmra.mrb[36].mxu0 %vm785_vm2, %v1850_v28 }
 0xfe1   : > { %2876 = vmatprep.mubr.msk.bf16.mxu0 %vm3665_vm0, %v3664_v0  ;;  %2873 = vmatpush3.bf16.msra.mxu0 %v3098_v36 }
 0xfe2   : > { %v1851_v31 = vpack.c.bf16 %v1847_v30, %v1847_v30  ;;  %2874 = vmatprep.subr.bf16.mxu0 %v3664_v0 }
 0xfe4   : > { %2869 = vmatmul.mubr.msk.bf16.vlgmr.msra.gmra.mrb[40].mxu1 %vm785_vm2, %v1851_v31 }
 0xfe5   : > { %2884 = vmatprep.mubr.msk.bf16.mxu1 %vm3665_vm0, %v3664_v0  ;;  %2875 = vmatpush3.bf16.msra.mxu0 %v3099_v37 }
 0xfe6   : > { %2888 = vmatprep.subr.bf16.mxu0 %v3664_v0  ;;  %2881 = vmatpush3.bf16.msra.mxu1 %v3100_v8 }
 0xfe7   : > { %2882 = vmatprep.subr.bf16.mxu1 %v3664_v0 }
 0xfea   : > { %2883 = vmatpush3.bf16.msra.mxu1 %v3101_v9 }
0x104a   : > { %v1894_v32 = vpop.f32.mrb[32].mxu0 }
0x104b   : > { %v2852_v33 = vpop.f32.mrb[33].mxu0 }
0x104c   : > { %v1897_v34 = vpop.f32.mrb[34].mxu0 }
0x104d   : > { %v2853_v35 = vpop.f32.mrb[35].mxu0 }
0x10af   : > { %v1942_v38 = vpop.f32.mrb[36].mxu1 }
0x10b0   : > { %2045 = vrot.lane.b32.xlu1 %v1942_v38, %s3671_s1  ;;  %v2858_v39 = vpop.f32.mrb[37].mxu1  ;;  %s3552_s1 = scalar_lea.vmem %s3551_s28, 256 }
0x10b1   : > { %v1945_v40 = vpop.f32.mrb[38].mxu1  ;;  %p3554_p11 = scmp.lt.s32.totalorder %s3552_s1, %s3546_s24 }
0x10b2   : > { %v2859_v41 = vpop.f32.mrb[39].mxu1 }
0x10b3   : > { %v1990_v42 = vpop.f32.mrb[36].mxu0  ;;  %p3555_p12 = por %p3554_p11, %p3553_p1 }
0x10b4   : > { %2049 = vrot.lane.b32.xlu0 %v1990_v42, %s3672_s6  ;;  %v2864_v43 = vpop.f32.mrb[37].mxu0 }
0x10b5   : > { %v1993_v44 = vpop.f32.mrb[38].mxu0  ;;  %p3556_p13 = pnand %p3555_p12, %p3549_p10 }
0x10b6   : > { %v2865_v45 = vpop.f32.mrb[39].mxu0 }
0x10b7   : > { %v2038_v46 = vpop.f32.mrb[40].mxu1 }
0x10b8   : > { %2053 = vrot.lane.b32.xlu1 %v2038_v46, %s3673_s21  ;;  %v2870_v47 = vpop.f32.mrb[41].mxu1 }
0x10b9   : > { %v2041_v48 = vpop.f32.mrb[42].mxu1 }
0x10ba   : > { %v2871_v49 = vpop.f32.mrb[43].mxu1 }
0x1122   : > { %v2046_v50 = vpop.permute.xlu1 %2045 }
0x1123   : > { %v2056_v52 = vsel %vm785_vm2, %v1894_v32, %v2046_v50 }
0x1126   : > { %v2050_v51 = vpop.permute.xlu0 %2049 }
0x1127   : > { %v2057_v53 = vsel %vm1233_vm4, %v2056_v52, %v2050_v51 }
0x112a   : > { %v2054_v54 = vpop.permute.xlu1 %2053 }
0x112b   : > { %v2058_v26 = vsel %vm1235_vm5, %v2057_v53, %v2054_v54 }
0x112c   : > { %v2059_v55 = vpack.c.bf16 %v2058_v26, %v2058_v26  ;;  %v2666_v26 = vld [vmem:[#allocation22 + $0x1] ss:$0 sm:$0xff] }
0x112e   : > { %2877 = vmatmul.mubr.msk.bf16.vlgmr.msra.gmra.mrb[40].mxu0 %vm718_vm1, %v2059_v55 }
0x112f   : > { %2896 = vmatprep.mubr.msk.bf16.mxu0 %vm3665_vm0, %v3664_v0  ;;  %2889 = vmatpush3.bf16.msra.mxu0 %v3102_v13 }
0x1130   : > { %2890 = vmatprep.subr.bf16.mxu0 %v3664_v0 }
0x1133   : > { %2891 = vmatpush3.bf16.msra.mxu0 %v3103_v18 }
0x1134   : > { %2892 = vmatprep.subr.bf16.mxu0 %v3664_v0 }
0x1137   : > { %2893 = vmatpush3.bf16.msra.mxu0 %v3104_v22 }
0x1138   : > { %2894 = vmatprep.subr.bf16.mxu0 %v3664_v0  ;;  %v2660_v0 = vld [vmem:[#allocation20 + $0x1] ss:$0 sm:$0xff] }
0x113b   : > { %2895 = vmatpush3.bf16.msra.mxu0 %v3105_v16 }
0x1201   : > { %v2122_v57 = vpop.f32.mrb[40].mxu0 }
0x1202   : > { %v2123_v58 = vadd.f32 %v2650_v56, %v2122_v57  ;;  %v2878_v59 = vpop.f32.mrb[41].mxu0  ;;  %v2667_v56 = vld [vmem:[#allocation23 + $0x1] ss:$0 sm:$0xff] }
0x1203   : > { %v2125_v60 = vpop.f32.mrb[42].mxu0 }
0x1204   : > { %v2879_v61 = vpop.f32.mrb[43].mxu0  ;;  %v2128_v62 = vadd.f32 %v2123_v58, %v4349_v2 }
0x1206   : > { %v2133_v63 = vsel %vm718_vm1, %v2128_v62, 0.0 }
0x1207   : > { %2134 = vadd.xlane.f32.xlu0 %v2133_v63 }
0x1294   : > { %v2135_v1 = vpop.xlane.xlu0 %2134 }
0x1295   : > { %v2136_v4 = vmul.f32 0.03125, %v2135_v1 }
0x1297   : > { %v2137_v5 = vsub.f32 %v2128_v62, %v2136_v4 }
0x1299   : > { %v2138_v6 = vmul.f32 %v2137_v5, %v2137_v5 }
0x129b   : > { %v2139_v7 = vsel %vm718_vm1, %v2138_v6, 0.0 }
0x129c   : > { %2140 = vadd.xlane.f32.xlu1 %v2139_v7 }
0x1329   : > { %v2141_v10 = vpop.xlane.xlu1 %2140 }
0x132a   : > { %v2142_v11 = vmul.f32 0.03125, %v2141_v10 }
0x132c   : > { %v2143_v12 = vadd.f32 1e-12, %v2142_v11 }
0x132e   : > { %3144 = vrsqrt.f32 %v2143_v12 }
0x1338   : > { %v3145_v2 = vpop.eup %3144 }
0x1339   : > { %v2145_v14 = vmul.f32 %v3145_v2, %v2137_v5 }
0x133b   : > { %v2152_v19 = vmul.f32 %v2654_v3, %v2145_v14 }
0x133d   : > { %v2159_v20 = vadd.f32 %v2655_v15, %v2152_v19 }
0x133f   : > { %v2160_v21 = vpack.c.bf16 %v2159_v20, %v2159_v20 }
0x1341   : > { %2885 = vmatmul.mubr.msk.bf16.vlgmr.msra.gmra.mrb[44].mxu1 %vm718_vm1, %v2160_v21 }
0x1414   : > { %v2223_v17 = vpop.f32.mrb[44].mxu1 }
0x1415   : > { %v2224_v24 = vadd.f32 %v2656_v23, %v2223_v17  ;;  %v2886_v25 = vpop.f32.mrb[45].mxu1 }
0x1416   : > { %v2226_v27 = vpop.f32.mrb[46].mxu1 }
0x1417   : > { %v2229_v28 = vmul.f32 %v2224_v24, %v2224_v24  ;;  %v2887_v29 = vpop.f32.mrb[47].mxu1 }
0x1419   : > { %v2230_v30 = vmul.f32 %v2229_v28, %v2224_v24 }
0x141b   : > { %v2231_v31 = vmul.f32 0.044715, %v2230_v30 }
0x141d   : > { %v2232_v32 = vadd.f32 %v2231_v31, %v2224_v24 }
0x141f   : > { %v2233_v33 = vmul.f32 0.7978846, %v2232_v32 }
0x1421   : > { %3146 = vtanh.f32 %v2233_v33 }
0x142b   : > { %v3147_v34 = vpop.eup %3146 }
0x142c   : > { %v2235_v35 = vadd.f32 1.0, %v3147_v34 }
0x142e   : > { %v2236_v36 = vmul.f32 0.5, %v2235_v35 }
0x1430   : > { %v2237_v37 = vmul.f32 %v2236_v36, %v2224_v24 }
0x1432   : > { %v2238_v38 = vpack.c.bf16 %v2237_v37, %v2237_v37 }
0x1434   : > { %2897 = vmatmul.mubr.msk.bf16.vlgmr.msra.gmra.mrb[44].mxu0 %vm1451_vm6, %v2238_v38 }
0x1507   : > { %v2317_v39 = vpop.f32.mrb[44].mxu0 }
0x1508   : > { %v2318_v40 = vadd.f32 %v2660_v0, %v2317_v39  ;;  %v2898_v41 = vpop.f32.mrb[45].mxu0 }
0x1509   : > { %v2320_v42 = vpop.f32.mrb[46].mxu0 }
0x150a   : > { %v2899_v43 = vpop.f32.mrb[47].mxu0  ;;  %v2323_v44 = vadd.f32 %v2318_v40, %v2159_v20 }
0x150c   : > { %v2328_v45 = vsel %vm718_vm1, %v2323_v44, 0.0 }
0x150d   : > { %2329 = vadd.xlane.f32.xlu0 %v2328_v45 }
0x159a   : > { %v2330_v46 = vpop.xlane.xlu0 %2329 }
0x159b   : > { %v2331_v47 = vmul.f32 0.03125, %v2330_v46 }
0x159d   : > { %v2332_v48 = vsub.f32 %v2323_v44, %v2331_v47 }
0x159f   : > { %v2333_v49 = vmul.f32 %v2332_v48, %v2332_v48 }
0x15a1   : > { %v2334_v50 = vsel %vm718_vm1, %v2333_v49, 0.0 }
0x15a2   : > { %2335 = vadd.xlane.f32.xlu0 %v2334_v50 }
0x162f   : > { %v2336_v51 = vpop.xlane.xlu0 %2335 }
0x1630   : > { %v2337_v52 = vmul.f32 0.03125, %v2336_v51 }
0x1632   : > { %v2338_v53 = vadd.f32 1e-12, %v2337_v52 }
0x1634   : > { %3148 = vrsqrt.f32 %v2338_v53 }
0x163e   : > { %v3149_v54 = vpop.eup %3148 }
0x163f   : > { %v2340_v55 = vmul.f32 %v3149_v54, %v2332_v48 }
0x1641   : > { %v2347_v57 = vmul.f32 %v2666_v26, %v2340_v55 }
0x1643   : > { %v2354_v58 = vadd.f32 %v2667_v56, %v2347_v57 }
0x1645   : > { %2355 = vst.msk [vmem:[%s690_s25] sm:$0xff] %vm718_vm1, %v2354_v58 }
0x1646   : > { %3559 = shalt.err (!%p3556_p13)
}
0x1647   : > { %s3560_s2 = scalar_lea.hbm %s4462_s18, 128  ;;  %s3564_s23 = scalar_lea.hbm %s4593_s17, 256 }
0x1648   : > { %p3561_p7 = scmp.ne.s32.totalorder %s4462_s18, %s3560_s2  ;;  %p3565_p2 = scmp.lt.u32.totalorder %s4462_s18, %s4593_s17 }
0x1649   : > { %p3566_p3 = scmp.lt.u32.totalorder %s3564_s23, %s3560_s2  ;;  %p3568_p4 = scmp.lt.u32.totalorder %s3560_s2, %s4462_s18 }
0x164a   : > { %p3562_p9 = pnand %p3561_p7, %p4594_p8 }
0x164b   : > { %p3567_p6 = por %p3566_p3, %p3565_p2 }
0x164c   : > { %p3563_p0 = pneg %p3562_p9 }
0x164d   : > { %p3569_p5 = por %p3568_p4, %p3567_p6 }
0x164f   : > { %p3570_p10 = pnand %p3569_p5, %p3563_p0 }
0x1651   : > { %3573 = shalt.err (!%p3570_p10)
}
0x1652   : > { %2952 = dma.vmem_to_hbm [thread:$0]  (%p4594_p8), %s4464_s29, 128, %s4462_s18, %s2357_s4  }
0x1653 PF: > { %s4595_s0 = sld [smem:[#allocation36_spill]]  ;;  %p4596_p1 = scmp.ne.s32.totalorder %s4570_s26, 0 }
0x1654   : > { %p4597_p11 = scmp.ge.s32.totalorder %s3644_s16, 2 }
0x1656   : > { %p2999_p12 = pnand %p4597_p11, %p4596_p1 }
0x1659   : > { %s2382_s24 = sand.u32 1, %s4595_s0  }
0x165a   : > { %s2383_s19 = scalar_lea.sflag [#allocation4], %s2382_s24 }
0x165b   : > { %3627 = dma.done.wait (!%p2999_p12), %s2383_s19, 128  }
0x165c   : > { %3629 = vsyncadd (!%p2999_p12), %s2383_s19, 4294967168  ;;  %p36_p13 = scmp.ge.s32.totalorder %s4066_s20, 4   ;;  %s4598_s29 = smov %s3636_s30 }
0x165d   : > { %s4599_s30 = smov %s3640_s15  ;;  %s4600_s15 = smov %s4077_s3 }
0x165e   : > { %s4601_s16 = smov %s4066_s20  ;;  %38 = sbr.rel (!%p36_p13) target bundleno = 22 (0x16), region = 194 }
0x1665   :  { %2388 = vsyncpa [#allocation3], 1 }
0x1666   :  { %2390 = vsyncpa [#allocation3 + $0x1], 1 }
0x1667   :  { %2391 = vsyncpa [#allocation6], 1 }
0x1668   :  { %2393 = vsyncpa [#allocation6 + $0x1], 1 }
0x1669   :  { %2394 = vsyncpa [#allocation9], 1 }
0x166a   :  { %2395 = vsyncpa [#allocation12], 1 }
0x166b   :  { %2396 = vsyncpa [#allocation15], 1 }
0x166c   :  { %2397 = vsyncpa [#allocation18], 1 }
0x166d   :  { %2398 = vsyncpa [#allocation21], 1 }
0x166e   :  { %2399 = vsyncpa [#allocation24], 1 }
0x166f   :  { %2400 = vsyncpa [#allocation4], 1 }
0x1670   :  { %2402 = vsyncpa [#allocation4 + $0x1], 1 }

</bundles_post_ra>
